<compile_context>
chip_gen: v7x
topology: tpu7x:2x2x1
jax: 0.10.0
libtpu: 0.0.40
codegen_flags: <defaults>
</compile_context>

<pallas_src>
import functools

import jax
import jax.numpy as jnp
from jax.experimental import pallas as pl
from jax.experimental.pallas import tpu as pltpu


def _rup(x, m):
    return (x + m - 1) // m * m


def _masked_softmax_fused(x, mask_row):
    """ESIM masked_softmax, algebraically fused.

    Original:  s = softmax(x*m); s = s*m; s / (sum(s) + 1e-13)
    Fused:     e*m / (sum(e*m) + 1e-13*sum(e)),  e = exp(x*m - max(x*m))

    x: (Bt, M, N) f32, mask_row: (Bt, 1, N) f32
    """
    xm = x * mask_row
    xmax = jnp.max(xm, axis=-1, keepdims=True)
    e = jnp.exp(xm - xmax)
    em = e * mask_row
    sum_e = jnp.sum(e, axis=-1, keepdims=True)
    sum_em = jnp.sum(em, axis=-1, keepdims=True)
    denom = sum_em + 1e-13 * sum_e
    # EUP approx reciprocal + one Newton-Raphson step (frees VPU divide slots,
    # ~1e-6 relative accuracy after refinement).
    r = pl.reciprocal(denom, approx=True)
    r = r * (2.0 - denom * r)
    return em * r


def _lim_kernel(p_ref, h_ref, pm_row_ref, hm_row_ref, pm_col_ref, hm_col_ref,
                out_p_ref, out_h_ref, *, block_batch, h_pad, high_precision):
    i = pl.program_id(0)
    b0 = pl.multiple_of(i * block_batch, block_batch)

    p = p_ref[...]                                   # (Bt, Lp, Hp) io dtype
    h = h_ref[...]                                   # (Bt, Lh, Hp)
    # Masks are resident whole-array blocks; slice out this batch block.
    pm_row = pm_row_ref[pl.ds(b0, block_batch)]      # (Bt, 1, Lp) f32
    hm_row = hm_row_ref[pl.ds(b0, block_batch)]      # (Bt, 1, Lh)
    pm_col = pm_col_ref[pl.ds(b0, block_batch)]      # (Bt, Lp, 1)
    hm_col = hm_col_ref[pl.ds(b0, block_batch)]      # (Bt, Lh, 1)

    prec = (jax.lax.Precision.HIGHEST if high_precision
            else jax.lax.Precision.DEFAULT)

    # One MXU contraction over H; the transposed similarity is a cheap XLU
    # transpose instead of a second full matmul.
    sim = jnp.einsum("bph,bqh->bpq", p, h,
                     preferred_element_type=jnp.float32,
                     precision=prec)                 # (Bt, Lp, Lh) f32
    simT = jnp.swapaxes(sim, 1, 2)                   # (Bt, Lh, Lp)

    attn_p = _masked_softmax_fused(sim, hm_row)      # (Bt, Lp, Lh) f32
    attn_h = _masked_softmax_fused(simT, pm_row)     # (Bt, Lh, Lp) f32

    # weighted_sum(hypothesis, prem_hyp_attn, premise_mask)
    att_p = jnp.einsum("bpq,bqh->bph", attn_p.astype(h.dtype), h,
                       preferred_element_type=jnp.float32,
                       precision=prec) * pm_col
    # weighted_sum(premise, hyp_prem_attn, hypothesis_mask)
    att_h = jnp.einsum("bqp,bph->bqh", attn_h.astype(p.dtype), p,
                       preferred_element_type=jnp.float32,
                       precision=prec) * hm_col

    # Elementwise math in f32 (v5e VPU has no bf16 path); store in io dtype.
    pf = p.astype(jnp.float32)
    hf = h.astype(jnp.float32)
    od = out_p_ref.dtype
    # Fused "concat": lane-aligned sub-slab stores into the (L, 2*Hp) outputs.
    out_p_ref[:, :, :h_pad] = (pf - att_p).astype(od)
    out_p_ref[:, :, h_pad:] = (pf * att_p).astype(od)
    out_h_ref[:, :, :h_pad] = (hf - att_h).astype(od)
    out_h_ref[:, :, h_pad:] = (hf * att_h).astype(od)


def _tpu_vmem_and_two_tc():
    vmem = 64 * 1024 * 1024          # conservative fallback (v7x-sized)
    try:
        vmem = pltpu.get_tpu_info().vmem_capacity_bytes
    except Exception:
        pass
    two_tc = False
    try:
        two_tc = "v7" in jax.devices()[0].device_kind.lower()
    except Exception:
        pass
    return vmem, two_tc


def _pick_block_batch(B, per_ex_bytes, budget_bytes, two_tc):
    """Largest batch block that divides B and fits the VMEM budget.
    Single-TC chips (v5e/v6e): no grid-length constraint (bigger is better).
    Dual-TC chips (v7x): prefer an even grid so both TensorCores stay busy."""
    fits = [d for d in range(1, B + 1)
            if B % d == 0 and d * per_ex_bytes <= budget_bytes]
    if not fits:
        return 1
    if two_tc and B >= 2:
        even = [d for d in fits if (B // d) % 2 == 0]
        if even:
            return max(even)
    return max(fits)


def local_inference_modeling(premise, hypothesis, premise_mask, hypothesis_mask,
                             block_batch=None):
    B, Lp, H = premise.shape
    _, Lh, _ = hypothesis.shape

    # Keep the model dtype for I/O (no f32 force-cast); f32 and bf16 supported.
    io_dtype = jnp.promote_types(premise.dtype, hypothesis.dtype)
    if io_dtype not in (jnp.dtype(jnp.float32), jnp.dtype(jnp.bfloat16),
                        jnp.dtype(jnp.float16)):
        io_dtype = jnp.dtype(jnp.float32)
    io_bytes = jnp.dtype(io_dtype).itemsize

    # Lane/sublane-dense padding: L -> mult of 8 (sublanes), H -> mult of 128
    # (lanes). Zero-padded features + zero-padded masks are absorbed exactly
    # by the masked softmax and the mask multiplies.
    Lp_p, Lh_p, Hp = _rup(Lp, 8), _rup(Lh, 8), _rup(H, 128)

    p = premise.astype(io_dtype)
    h = hypothesis.astype(io_dtype)
    if (Lp_p, Hp) != (Lp, H):
        p = jnp.pad(p, ((0, 0), (0, Lp_p - Lp), (0, Hp - H)))
    if (Lh_p, Hp) != (Lh, H):
        h = jnp.pad(h, ((0, 0), (0, Lh_p - Lh), (0, Hp - H)))

    pm = premise_mask.reshape(B, Lp).astype(jnp.float32)
    hm = hypothesis_mask.reshape(B, Lh).astype(jnp.float32)
    if Lp_p != Lp:
        pm = jnp.pad(pm, ((0, 0), (0, Lp_p - Lp)))
    if Lh_p != Lh:
        hm = jnp.pad(hm, ((0, 0), (0, Lh_p - Lh)))
    pm_row = pm.reshape(B, 1, Lp_p)
    hm_row = hm.reshape(B, 1, Lh_p)
    pm_col = pm.reshape(B, Lp_p, 1)
    hm_col = hm.reshape(B, Lh_p, 1)

    vmem_cap, two_tc = _tpu_vmem_and_two_tc()
    vmem_budget = int(min(vmem_cap // 2, 64 * 1024 * 1024))

    # VMEM cost of the resident (whole-array) f32 mask blocks, (8,128)-padded.
    def _tile_bytes(rows, cols):
        return _rup(max(rows, 1), 8) * _rup(max(cols, 1), 128) * 4
    mask_bytes = B * (_tile_bytes(1, Lp_p) + _tile_bytes(1, Lh_p)
                      + _tile_bytes(Lp_p, 1) + _tile_bytes(Lh_p, 1))

    # Per-example working set: double-buffered I/O + f32 temporaries, with a
    # 30% margin for exp temps / layout padding / compiler scratch (v7x: 32 MiB
    # budget, underestimating here would push the kernel into the spill regime).
    per_ex = (2 * io_bytes * (Lp_p + Lh_p) * Hp            # p, h       (x2 bufs)
              + 2 * io_bytes * (Lp_p + Lh_p) * 2 * Hp      # out_p/out_h (x2 bufs)
              + 4 * (2 * (Lp_p + Lh_p) * Hp)               # att_* + f32 upcasts
              + 4 * 6 * Lp_p * Lh_p)                       # sim/simT/attn/e/em
    per_ex = int(per_ex * 1.3)

    if block_batch is None:
        block_batch = _pick_block_batch(
            B, per_ex, max(vmem_budget - mask_bytes, per_ex), two_tc)
    assert B % block_batch == 0, "block_batch must divide the batch size"
    Bt = block_batch

    kernel = functools.partial(
        _lim_kernel, block_batch=Bt, h_pad=Hp,
        high_precision=(io_dtype == jnp.dtype(jnp.float32)))

    grid_spec = pltpu.PrefetchScalarGridSpec(
        num_scalar_prefetch=0,
        grid=(B // Bt,),
        in_specs=[
            pl.BlockSpec((Bt, Lp_p, Hp), lambda b: (b, 0, 0)),
            pl.BlockSpec((Bt, Lh_p, Hp), lambda b: (b, 0, 0)),
            # Masks: whole-array resident blocks -> DMA'd once, not per step.
            pl.BlockSpec((B, 1, Lp_p), lambda b: (0, 0, 0)),
            pl.BlockSpec((B, 1, Lh_p), lambda b: (0, 0, 0)),
            pl.BlockSpec((B, Lp_p, 1), lambda b: (0, 0, 0)),
            pl.BlockSpec((B, Lh_p, 1), lambda b: (0, 0, 0)),
        ],
        out_specs=[
            pl.BlockSpec((Bt, Lp_p, 2 * Hp), lambda b: (b, 0, 0)),
            pl.BlockSpec((Bt, Lh_p, 2 * Hp), lambda b: (b, 0, 0)),
        ],
    )

    out_p, out_h = pl.pallas_call(
        kernel,
        out_shape=(
            jax.ShapeDtypeStruct((B, Lp_p, 2 * Hp), io_dtype),
            jax.ShapeDtypeStruct((B, Lh_p, 2 * Hp), io_dtype),
        ),
        grid_spec=grid_spec,
        compiler_params=pltpu.CompilerParams(
            dimension_semantics=("parallel",),
            vmem_limit_bytes=vmem_budget),
    )(p, h, pm_row, hm_row, pm_col, hm_col)

    # Un-pad. When H is already lane-aligned the kernel output IS the final
    # concatenated result (no wrapper concat at all).
    if Hp == H:
        compose_premise = out_p if Lp_p == Lp else out_p[:, :Lp, :]
        compose_hypothesis = out_h if Lh_p == Lh else out_h[:, :Lh, :]
    else:
        compose_premise = jnp.concatenate(
            [out_p[:, :Lp, :H], out_p[:, :Lp, Hp:Hp + H]], axis=-1)
        compose_hypothesis = jnp.concatenate(
            [out_h[:, :Lh, :H], out_h[:, :Lh, Hp:Hp + H]], axis=-1)
    return compose_premise, compose_hypothesis


def _reference(premise, hypothesis, premise_mask, hypothesis_mask):
    """Pure-JAX port of the PyTorch forward for validation."""
    HI = jax.lax.Precision.HIGHEST

    def masked_softmax(t, mask):
        m = jnp.broadcast_to(mask[:, None, :], t.shape).astype(jnp.float32)
        r = jax.nn.softmax(t * m, axis=-1)
        r = r * m
        return r / (jnp.sum(r, axis=-1, keepdims=True) + 1e-13)

    def weighted_sum(tensor, weights, mask):
        ws = jnp.einsum("bij,bjh->bih", weights, tensor, precision=HI)
        return ws * mask[:, :, None].astype(jnp.float32)

    sim = jnp.einsum("bph,bqh->bpq", premise, hypothesis, precision=HI)
    p2h = masked_softmax(sim, hypothesis_mask)
    h2p = masked_softmax(jnp.swapaxes(sim, 1, 2), premise_mask)
    att_p = weighted_sum(hypothesis, p2h, premise_mask)
    att_h = weighted_sum(premise, h2p, hypothesis_mask)
    cp = jnp.concatenate([premise - att_p, premise * att_p], axis=-1)
    ch = jnp.concatenate([hypothesis - att_h, hypothesis * att_h], axis=-1)
    return cp, ch


if __name__ == "__main__":
    B, Lp, Lh, H = 4, 8, 16, 32
    key = jax.random.PRNGKey(0)
    kp, kh = jax.random.split(key)
    premise = jax.random.normal(kp, (B, Lp, H), dtype=jnp.float32)
    hypothesis = jax.random.normal(kh, (B, Lh, H), dtype=jnp.float32)

    # Deterministic padding masks (1 = token, 0 = pad).
    p_lens = jnp.array([Lp, Lp - 3, Lp, Lp - 2])
    h_lens = jnp.array([Lh - 5, Lh, Lh - 7, Lh])
    premise_mask = (jnp.arange(Lp)[None, :] < p_lens[:, None]).astype(jnp.float32)
    hypothesis_mask = (jnp.arange(Lh)[None, :] < h_lens[:, None]).astype(jnp.float32)

    cp, ch = local_inference_modeling(premise, hypothesis,
                                      premise_mask, hypothesis_mask)
    jax.block_until_ready((cp, ch))

    cp_ref, ch_ref = _reference(premise, hypothesis, premise_mask, hypothesis_mask)
    assert cp.shape == (B, Lp, 2 * H) and ch.shape == (B, Lh, 2 * H)
    # Tolerance leaves headroom for the approx-reciprocal(+Newton) softmax
    # normalization and MXU-vs-XLA rounding differences.
    assert jnp.allclose(cp, cp_ref, atol=5e-5, rtol=5e-5), \
        float(jnp.max(jnp.abs(cp - cp_ref)))
    assert jnp.allclose(ch, ch_ref, atol=5e-5, rtol=5e-5), \
        float(jnp.max(jnp.abs(ch - ch_ref)))

    print("KERNEL_OK")
</pallas_src>

<mosaic_0001>
module attributes {stable_mosaic.version = 11 : i64} {
  func.func @_lim_kernel(%arg0: i32, %arg1: memref<4x8x128xf32, #tpu.memory_space<vmem>>, %arg2: memref<4x16x128xf32, #tpu.memory_space<vmem>>, %arg3: memref<4x1x8xf32, #tpu.memory_space<vmem>>, %arg4: memref<4x1x16xf32, #tpu.memory_space<vmem>>, %arg5: memref<4x8x1xf32, #tpu.memory_space<vmem>>, %arg6: memref<4x16x1xf32, #tpu.memory_space<vmem>>, %arg7: memref<4x8x256xf32, #tpu.memory_space<vmem>>, %arg8: memref<4x16x256xf32, #tpu.memory_space<vmem>>) attributes {dimension_semantics = [#tpu.dimension_semantics<parallel>], iteration_bounds = array<i64: 1>, scalar_prefetch = 0 : i64, scratch_operands = 0 : i64, tpu.core_type = #tpu.core_type<tc>, window_params = [{transform_indices = @transform_0, window_bounds = array<i64: 4, 8, 128>}, {transform_indices = @transform_1, window_bounds = array<i64: 4, 16, 128>}, {pipeline_mode = #tpu.pipeline_mode<synchronous>, transform_indices = @transform_2, window_bounds = array<i64: 4, 1, 8>}, {pipeline_mode = #tpu.pipeline_mode<synchronous>, transform_indices = @transform_3, window_bounds = array<i64: 4, 1, 16>}, {pipeline_mode = #tpu.pipeline_mode<synchronous>, transform_indices = @transform_4, window_bounds = array<i64: 4, 8, 1>}, {pipeline_mode = #tpu.pipeline_mode<synchronous>, transform_indices = @transform_5, window_bounds = array<i64: 4, 16, 1>}, {transform_indices = @transform_6, window_bounds = array<i64: 4, 8, 256>}, {transform_indices = @transform_7, window_bounds = array<i64: 4, 16, 256>}]} {
    %c4_i32 = arith.constant 4 : i32
    %0 = arith.muli %arg0, %c4_i32 : i32
    %1 = tpu.assume_multiple %0, 4 : i32
    %c0 = arith.constant 0 : index
    %c0_0 = arith.constant 0 : index
    %c0_1 = arith.constant 0 : index
    %2 = vector.load %arg1[%c0, %c0_0, %c0_1] : memref<4x8x128xf32, #tpu.memory_space<vmem>>, vector<4x8x128xf32>
    %c0_2 = arith.constant 0 : index
    %c0_3 = arith.constant 0 : index
    %c0_4 = arith.constant 0 : index
    %3 = vector.load %arg2[%c0_2, %c0_3, %c0_4] : memref<4x16x128xf32, #tpu.memory_space<vmem>>, vector<4x16x128xf32>
    %4 = arith.index_cast %1 : i32 to index
    %c0_5 = arith.constant 0 : index
    %c0_6 = arith.constant 0 : index
    %5 = vector.load %arg3[%4, %c0_5, %c0_6] : memref<4x1x8xf32, #tpu.memory_space<vmem>>, vector<4x1x8xf32>
    %6 = arith.index_cast %1 : i32 to index
    %c0_7 = arith.constant 0 : index
    %c0_8 = arith.constant 0 : index
    %7 = vector.load %arg4[%6, %c0_7, %c0_8] : memref<4x1x16xf32, #tpu.memory_space<vmem>>, vector<4x1x16xf32>
    %8 = arith.index_cast %1 : i32 to index
    %c0_9 = arith.constant 0 : index
    %c0_10 = arith.constant 0 : index
    %9 = vector.load %arg5[%8, %c0_9, %c0_10] : memref<4x8x1xf32, #tpu.memory_space<vmem>>, vector<4x8x1xf32>
    %10 = arith.index_cast %1 : i32 to index
    %c0_11 = arith.constant 0 : index
    %c0_12 = arith.constant 0 : index
    %11 = vector.load %arg6[%10, %c0_11, %c0_12] : memref<4x16x1xf32, #tpu.memory_space<vmem>>, vector<4x16x1xf32>
    "tpu.trace_start"() <{level = 10 : i32, message = "bph,bqh->bpq"}> : () -> ()
    %cst = arith.constant dense<0.000000e+00> : vector<4x8x16xf32>
    %12 = tpu.matmul %2, %3, %cst {dimension_numbers = #tpu.dot_dimension_numbers<[2], [2], [1], [1], [0, 0, 0, 1, 1, 1], [0], [0]>, precision = #tpu.contract_precision<fp32>} : vector<4x8x128xf32>, vector<4x16x128xf32>, vector<4x8x16xf32> -> vector<4x8x16xf32>
    "tpu.trace_stop"() : () -> ()
    %13 = tpu.transpose %12, [0, 2, 1] : vector<4x8x16xf32> -> vector<4x16x8xf32>
    %14 = vector.broadcast %7 : vector<4x1x16xf32> to vector<4x8x16xf32>
    %15 = arith.mulf %12, %14 : vector<4x8x16xf32>
    %cst_13 = arith.constant dense<0xFF800000> : vector<4x8xf32>
    %16 = vector.multi_reduction <maximumf>, %15, %cst_13 [2] : vector<4x8x16xf32> to vector<4x8xf32>
    %17 = vector.shape_cast %16 : vector<4x8xf32> to vector<4x8x1xf32>
    %18 = vector.broadcast %17 : vector<4x8x1xf32> to vector<4x8x16xf32>
    %19 = arith.subf %15, %18 : vector<4x8x16xf32>
    %20 = math.exp %19 : vector<4x8x16xf32>
    %21 = vector.broadcast %7 : vector<4x1x16xf32> to vector<4x8x16xf32>
    %22 = arith.mulf %20, %21 : vector<4x8x16xf32>
    %cst_14 = arith.constant dense<0.000000e+00> : vector<4x8xf32>
    %23 = vector.multi_reduction <add>, %20, %cst_14 [2] : vector<4x8x16xf32> to vector<4x8xf32>
    %24 = vector.shape_cast %23 : vector<4x8xf32> to vector<4x8x1xf32>
    %cst_15 = arith.constant dense<0.000000e+00> : vector<4x8xf32>
    %25 = vector.multi_reduction <add>, %22, %cst_15 [2] : vector<4x8x16xf32> to vector<4x8xf32>
    %26 = vector.shape_cast %25 : vector<4x8xf32> to vector<4x8x1xf32>
    %cst_16 = arith.constant 9.99999982E-14 : f32
    %27 = vector.broadcast %cst_16 : f32 to vector<4x8x1xf32>
    %28 = arith.mulf %27, %24 : vector<4x8x1xf32>
    %29 = arith.addf %26, %28 : vector<4x8x1xf32>
    %30 = tpu.reciprocal %29 {approx = true} : vector<4x8x1xf32> -> vector<4x8x1xf32>
    %31 = arith.mulf %29, %30 : vector<4x8x1xf32>
    %cst_17 = arith.constant 2.000000e+00 : f32
    %32 = vector.broadcast %cst_17 : f32 to vector<4x8x1xf32>
    %33 = arith.subf %32, %31 : vector<4x8x1xf32>
    %34 = arith.mulf %30, %33 : vector<4x8x1xf32>
    %35 = vector.broadcast %34 : vector<4x8x1xf32> to vector<4x8x16xf32>
    %36 = arith.mulf %22, %35 : vector<4x8x16xf32>
    %37 = vector.broadcast %5 : vector<4x1x8xf32> to vector<4x16x8xf32>
    %38 = arith.mulf %13, %37 : vector<4x16x8xf32>
    %cst_18 = arith.constant dense<0xFF800000> : vector<4x16xf32>
    %39 = vector.multi_reduction <maximumf>, %38, %cst_18 [2] : vector<4x16x8xf32> to vector<4x16xf32>
    %40 = vector.shape_cast %39 : vector<4x16xf32> to vector<4x16x1xf32>
    %41 = vector.broadcast %40 : vector<4x16x1xf32> to vector<4x16x8xf32>
    %42 = arith.subf %38, %41 : vector<4x16x8xf32>
    %43 = math.exp %42 : vector<4x16x8xf32>
    %44 = vector.broadcast %5 : vector<4x1x8xf32> to vector<4x16x8xf32>
    %45 = arith.mulf %43, %44 : vector<4x16x8xf32>
    %cst_19 = arith.constant dense<0.000000e+00> : vector<4x16xf32>
    %46 = vector.multi_reduction <add>, %43, %cst_19 [2] : vector<4x16x8xf32> to vector<4x16xf32>
    %47 = vector.shape_cast %46 : vector<4x16xf32> to vector<4x16x1xf32>
    %cst_20 = arith.constant dense<0.000000e+00> : vector<4x16xf32>
    %48 = vector.multi_reduction <add>, %45, %cst_20 [2] : vector<4x16x8xf32> to vector<4x16xf32>
    %49 = vector.shape_cast %48 : vector<4x16xf32> to vector<4x16x1xf32>
    %cst_21 = arith.constant 9.99999982E-14 : f32
    %50 = vector.broadcast %cst_21 : f32 to vector<4x16x1xf32>
    %51 = arith.mulf %50, %47 : vector<4x16x1xf32>
    %52 = arith.addf %49, %51 : vector<4x16x1xf32>
    %53 = tpu.reciprocal %52 {approx = true} : vector<4x16x1xf32> -> vector<4x16x1xf32>
    %54 = arith.mulf %52, %53 : vector<4x16x1xf32>
    %cst_22 = arith.constant 2.000000e+00 : f32
    %55 = vector.broadcast %cst_22 : f32 to vector<4x16x1xf32>
    %56 = arith.subf %55, %54 : vector<4x16x1xf32>
    %57 = arith.mulf %53, %56 : vector<4x16x1xf32>
    %58 = vector.broadcast %57 : vector<4x16x1xf32> to vector<4x16x8xf32>
    %59 = arith.mulf %45, %58 : vector<4x16x8xf32>
    "tpu.trace_start"() <{level = 10 : i32, message = "bpq,bqh->bph"}> : () -> ()
    %cst_23 = arith.constant dense<0.000000e+00> : vector<4x8x128xf32>
    %60 = tpu.matmul %36, %3, %cst_23 {dimension_numbers = #tpu.dot_dimension_numbers<[2], [1], [1], [2], [0, 0, 0, 1, 1, 2], [0], [0]>, precision = #tpu.contract_precision<fp32>} : vector<4x8x16xf32>, vector<4x16x128xf32>, vector<4x8x128xf32> -> vector<4x8x128xf32>
    "tpu.trace_stop"() : () -> ()
    %61 = vector.broadcast %9 : vector<4x8x1xf32> to vector<4x8x128xf32>
    %62 = arith.mulf %60, %61 : vector<4x8x128xf32>
    "tpu.trace_start"() <{level = 10 : i32, message = "bqp,bph->bqh"}> : () -> ()
    %cst_24 = arith.constant dense<0.000000e+00> : vector<4x16x128xf32>
    %63 = tpu.matmul %59, %2, %cst_24 {dimension_numbers = #tpu.dot_dimension_numbers<[2], [1], [1], [2], [0, 0, 0, 1, 1, 2], [0], [0]>, precision = #tpu.contract_precision<fp32>} : vector<4x16x8xf32>, vector<4x8x128xf32>, vector<4x16x128xf32> -> vector<4x16x128xf32>
    "tpu.trace_stop"() : () -> ()
    %64 = vector.broadcast %11 : vector<4x16x1xf32> to vector<4x16x128xf32>
    %65 = arith.mulf %63, %64 : vector<4x16x128xf32>
    %66 = arith.subf %2, %62 : vector<4x8x128xf32>
    %c0_25 = arith.constant 0 : index
    %c0_26 = arith.constant 0 : index
    %c0_27 = arith.constant 0 : index
    %67 = vector.load %arg7[%c0_25, %c0_26, %c0_27] : memref<4x8x256xf32, #tpu.memory_space<vmem>>, vector<4x8x128xf32>
    tpu.vector_store %arg7[%c0_25, %c0_26, %c0_27], %66 {strides = array<i32>} : memref<4x8x256xf32, #tpu.memory_space<vmem>>, vector<4x8x128xf32>,
    %68 = arith.mulf %2, %62 : vector<4x8x128xf32>
    %c0_28 = arith.constant 0 : index
    %c0_29 = arith.constant 0 : index
    %c128 = arith.constant 128 : index
    %69 = vector.load %arg7[%c0_28, %c0_29, %c128] : memref<4x8x256xf32, #tpu.memory_space<vmem>>, vector<4x8x128xf32>
    tpu.vector_store %arg7[%c0_28, %c0_29, %c128], %68 {strides = array<i32>} : memref<4x8x256xf32, #tpu.memory_space<vmem>>, vector<4x8x128xf32>,
    %70 = arith.subf %3, %65 : vector<4x16x128xf32>
    %c0_30 = arith.constant 0 : index
    %c0_31 = arith.constant 0 : index
    %c0_32 = arith.constant 0 : index
    %71 = vector.load %arg8[%c0_30, %c0_31, %c0_32] : memref<4x16x256xf32, #tpu.memory_space<vmem>>, vector<4x16x128xf32>
    tpu.vector_store %arg8[%c0_30, %c0_31, %c0_32], %70 {strides = array<i32>} : memref<4x16x256xf32, #tpu.memory_space<vmem>>, vector<4x16x128xf32>,
    %72 = arith.mulf %3, %65 : vector<4x16x128xf32>
    %c0_33 = arith.constant 0 : index
    %c0_34 = arith.constant 0 : index
    %c128_35 = arith.constant 128 : index
    %73 = vector.load %arg8[%c0_33, %c0_34, %c128_35] : memref<4x16x256xf32, #tpu.memory_space<vmem>>, vector<4x16x128xf32>
    tpu.vector_store %arg8[%c0_33, %c0_34, %c128_35], %72 {strides = array<i32>} : memref<4x16x256xf32, #tpu.memory_space<vmem>>, vector<4x16x128xf32>,
    return
  }
  func.func @transform_0(%arg0: i32) -> (i32, i32, i32) {
    %c0_i32 = arith.constant 0 : i32
    %c0_i32_0 = arith.constant 0 : i32
    %c0_i32_1 = arith.constant 0 : i32
    return %arg0, %c0_i32, %c0_i32_0 : i32, i32, i32
  }
  func.func @transform_1(%arg0: i32) -> (i32, i32, i32) {
    %c0_i32 = arith.constant 0 : i32
    %c0_i32_0 = arith.constant 0 : i32
    %c0_i32_1 = arith.constant 0 : i32
    return %arg0, %c0_i32, %c0_i32_0 : i32, i32, i32
  }
  func.func @transform_2(%arg0: i32) -> (i32, i32, i32) {
    %c0_i32 = arith.constant 0 : i32
    %c0_i32_0 = arith.constant 0 : i32
    %c0_i32_1 = arith.constant 0 : i32
    %c0_i32_2 = arith.constant 0 : i32
    return %c0_i32, %c0_i32_0, %c0_i32_1 : i32, i32, i32
  }
  func.func @transform_3(%arg0: i32) -> (i32, i32, i32) {
    %c0_i32 = arith.constant 0 : i32
    %c0_i32_0 = arith.constant 0 : i32
    %c0_i32_1 = arith.constant 0 : i32
    %c0_i32_2 = arith.constant 0 : i32
    return %c0_i32, %c0_i32_0, %c0_i32_1 : i32, i32, i32
  }
  func.func @transform_4(%arg0: i32) -> (i32, i32, i32) {
    %c0_i32 = arith.constant 0 : i32
    %c0_i32_0 = arith.constant 0 : i32
    %c0_i32_1 = arith.constant 0 : i32
    %c0_i32_2 = arith.constant 0 : i32
    return %c0_i32, %c0_i32_0, %c0_i32_1 : i32, i32, i32
  }
  func.func @transform_5(%arg0: i32) -> (i32, i32, i32) {
    %c0_i32 = arith.constant 0 : i32
    %c0_i32_0 = arith.constant 0 : i32
    %c0_i32_1 = arith.constant 0 : i32
    %c0_i32_2 = arith.constant 0 : i32
    return %c0_i32, %c0_i32_0, %c0_i32_1 : i32, i32, i32
  }
  func.func @transform_6(%arg0: i32) -> (i32, i32, i32) {
    %c0_i32 = arith.constant 0 : i32
    %c0_i32_0 = arith.constant 0 : i32
    %c0_i32_1 = arith.constant 0 : i32
    return %arg0, %c0_i32, %c0_i32_0 : i32, i32, i32
  }
  func.func @transform_7(%arg0: i32) -> (i32, i32, i32) {
    %c0_i32 = arith.constant 0 : i32
    %c0_i32_0 = arith.constant 0 : i32
    %c0_i32_1 = arith.constant 0 : i32
    return %arg0, %c0_i32, %c0_i32_0 : i32, i32, i32
  }
}

</mosaic_0001>

<bundles_post_ra>
// kernel: tpu_custom_call.1
= control target key start
LH: loop header
LB: loop body
LE: loop exit
PB: predicated region body
PF: predicated region fallthrough
CT: control target
= control target key end

     0   :  { %13 = vsyncpa [#allocation3], 0  ;;  %v8222_v3 = vmov 0.0|0.0   ;;  %vm7375_vm0 = vmmov 0   ;;  %v8224_v11 = vmov 0.0   ;;  %s8214_s0 = inlined_call_operand.vmem [shape: f32[4,8,128], index: 0, kind: input, shape index: {}]   ;;  %s8215_s1 = inlined_call_operand.vmem [shape: f32[4,16,128], index: 1, kind: input, shape index: {}]   ;;  %s8216_s2 = inlined_call_operand.vmem [shape: f32[4,1,8], index: 2, kind: input, shape index: {}]   ;;  %s8217_s3 = inlined_call_operand.vmem [shape: f32[4,1,16], index: 3, kind: input, shape index: {}]   ;;  %s8218_s4 = inlined_call_operand.vmem [shape: f32[4,8,1], index: 4, kind: input, shape index: {}]   ;;  %s8219_s5 = inlined_call_operand.vmem [shape: f32[4,16,1], index: 5, kind: input, shape index: {}]   ;;  %s8220_s6 = inlined_call_operand.hbm [shape: f32[4,8,256], index: 6, kind: output, shape index: {0}]   ;;  %s8221_s7 = inlined_call_operand.hbm [shape: f32[4,16,256], index: 7, kind: output, shape index: {1}]  }
   0x1   :  { %v32_v0 = vld [vmem:[%s8215_s1] sm:$0xff]  ;;  %v33_v1 = vld [vmem:[%s8215_s1 + $0x8] sm:$0xff]  ;;  %v34_v2 = vld [vmem:[%s8215_s1 + $0x10] sm:$0xff]  ;;  %6992 = vmatprep.subr.bf16.mxu0 %v8222_v3  ;;  %7010 = vmatprep.subr.bf16.mxu1 %v8222_v3 }
   0x2   :  { %v67_v4 = vand.u32 4294901760, %v32_v0  ;;  %v70_v5 = vand.u32 4294901760, %v33_v1  ;;  %v35_v6 = vld [vmem:[%s8215_s1 + $0x18] sm:$0xff]  ;;  %v526_v7 = vand.u32 4294901760, %v34_v2  ;;  %v28_v8 = vld [vmem:[%s8214_s0] sm:$0xff]  ;;  %v29_v9 = vld [vmem:[%s8214_s0 + $0x8] sm:$0xff]  ;;  %6540 = vmatprep.mubr.msk.f32.mxu0 %vm7375_vm0, %v8224_v11  ;;  %6582 = vmatprep.mubr.msk.f32.mxu1 %vm7375_vm0, %v8224_v11 }
   0x3   :  { %v529_v10 = vand.u32 4294901760, %v35_v6  ;;  %v7446_v12 = vand.u32 4294901760, %v28_v8  ;;  %v7448_v13 = vand.u32 4294901760, %v29_v9 }
   0x4   :  { %v7450_v14 = vpack.c.bf16 %v70_v5, %v67_v4  ;;  %v145_v15 = vsub.f32 %v32_v0, %v67_v4  ;;  %v152_v16 = vsub.f32 %v33_v1, %v70_v5  ;;  %v604_v17 = vsub.f32 %v34_v2, %v526_v7 }
   0x5   :  { %v7452_v18 = vpack.c.bf16 %v529_v10, %v526_v7  ;;  %v7455_v19 = vsub.f32 %v28_v8, %v7446_v12  ;;  %v7458_v20 = vsub.f32 %v29_v9, %v7448_v13  ;;  %v611_v21 = vsub.f32 %v35_v6, %v529_v10 }
   0x6   :  { %14 = vsyncpa [#allocation5], 0  ;;  %6994 = vmatpush3.bf16.xpose.msra.mxu0 %v7450_v14  ;;  %v146_v22 = vand.u32 4294901760, %v145_v15  ;;  %v153_v23 = vand.u32 4294901760, %v152_v16  ;;  %v605_v24 = vand.u32 4294901760, %v604_v17  ;;  %v7492_v42 = vpack.c.bf16 %v152_v16, %v145_v15  ;;  %v36_v46 = vld [vmem:[%s8215_s1 + $0x20] sm:$0xff] }
   0x7   :  { %7012 = vmatpush3.bf16.xpose.msra.mxu1 %v7452_v18  ;;  %v7463_v25 = vand.u32 4294901760, %v7455_v19  ;;  %6995 = vmatprep.subr.bf16.mxu0 %v8222_v3  ;;  %v7467_v26 = vand.u32 4294901760, %v7458_v20  ;;  %v612_v27 = vand.u32 4294901760, %v611_v21  ;;  %v7494_v43 = vpack.c.bf16 %v611_v21, %v604_v17  ;;  %v37_v47 = vld [vmem:[%s8215_s1 + $0x28] sm:$0xff]  ;;  %v38_v48 = vld [vmem:[%s8215_s1 + $0x30] sm:$0xff]  ;;  %v39_v49 = vld [vmem:[%s8215_s1 + $0x38] sm:$0xff] }
   0x8   :  { %7013 = vmatprep.subr.bf16.mxu1 %v8222_v3  ;;  %v147_v28 = vsub.f32 %v145_v15, %v146_v22  ;;  %v154_v29 = vsub.f32 %v152_v16, %v153_v23  ;;  %v606_v30 = vsub.f32 %v604_v17, %v605_v24  ;;  %v7516_v44 = vpack.c.bf16 %v153_v23, %v146_v22  ;;  %v30_v52 = vld [vmem:[%s8214_s0 + $0x10] sm:$0xff]  ;;  %v31_v55 = vld [vmem:[%s8214_s0 + $0x18] sm:$0xff]  ;;  %s7378_s24 = smov [#allocation2]  }
   0x9   :  { %v136_v31 = vsub.f32 %v7455_v19, %v7463_v25  ;;  %v595_v32 = vsub.f32 %v7458_v20, %v7467_v26  ;;  %v613_v33 = vsub.f32 %v611_v21, %v612_v27  ;;  %v7518_v45 = vpack.c.bf16 %v612_v27, %v605_v24  ;;  %s6285_s25 = sshll.u32 %s7378_s24, 4  ;;  %s6286_s25 = int_to_ptr.vmem [resolvable:$true] %s6285_s25 }
   0xa   :  { %v148_v34 = vand.u32 4294901760, %v147_v28  ;;  %v155_v35 = vand.u32 4294901760, %v154_v29  ;;  %v607_v36 = vand.u32 4294901760, %v606_v30  ;;  %v985_v50 = vand.u32 4294901760, %v36_v46  ;;  %p7331_p1 = scmp.lt.s32.totalorder %s6286_s25, %s6286_s25 }
   0xb   :  { %v7474_v37 = vand.u32 4294901760, %v136_v31  ;;  %v7476_v38 = vand.u32 4294901760, %v595_v32  ;;  %v614_v39 = vand.u32 4294901760, %v613_v33  ;;  %v988_v51 = vand.u32 4294901760, %v37_v47 }
   0xc   :  { %v7478_v40 = vpack.c.bf16 %v155_v35, %v148_v34  ;;  %v1444_v53 = vand.u32 4294901760, %v38_v48  ;;  %v1447_v54 = vand.u32 4294901760, %v39_v49  ;;  %v7548_v56 = vand.u32 4294901760, %v30_v52 }
   0xd   :  { %6541 = vmatmul.mubr.f32.vlgmr.msra.gmra.mrb[0].mxu0 %v7474_v37  ;;  %v7481_v41 = vpack.c.bf16 %v614_v39, %v607_v36  ;;  %v7550_v57 = vsub.f32 %v36_v46, %v985_v50  ;;  %v7552_v58 = vsub.f32 %v37_v47, %v988_v51  ;;  %v7554_v59 = vand.u32 4294901760, %v31_v55  ;;  %v6312_v36 = vld [vmem:[%s8217_s3] ss:$0 sm:$0xff]  ;;  %v6313_v46 = vld [vmem:[%s8217_s3 + $0x1] ss:$0 sm:$0xff] }
   0xe   :  { %6583 = vmatmul.mubr.f32.vlgmr.msra.gmra.mrb[0].mxu1 %v7476_v38  ;;  %6997 = vmatpush3.bf16.xpose.msra.mxu0 %v7478_v40  ;;  %v7556_v60 = vsub.f32 %v38_v48, %v1444_v53  ;;  %v7558_v61 = vsub.f32 %v39_v49, %v1447_v54  ;;  %v7562_v62 = vsub.f32 %v30_v52, %v7548_v56  ;;  %vm2058_vm1 = vcmask 130048  }
   0xf   :  { %7015 = vmatpush3.bf16.xpose.msra.mxu1 %v7481_v41  ;;  %6547 = vmatprep.mubr.msk.f32.mxu0 %vm7375_vm0, %v8224_v11  ;;  %v1064_v63 = vand.u32 4294901760, %v7550_v57  ;;  %v1071_v0 = vand.u32 4294901760, %v7552_v58  ;;  %v7569_v1 = vsub.f32 %v31_v55, %v7554_v59  ;;  %v7583_v6 = vpack.c.bf16 %v988_v51, %v985_v50  ;;  %v7704_v55 = vld [vmem:[%s8217_s3 + $0x3] ss:$0 sm:$0xff] }
  0x10   :  { %6589 = vmatprep.mubr.msk.f32.mxu1 %vm7375_vm0, %v8224_v11  ;;  %6998 = vmatprep.subr.bf16.mxu0 %v8222_v3  ;;  %v1523_v2 = vand.u32 4294901760, %v7556_v60  ;;  %v1530_v4 = vand.u32 4294901760, %v7558_v61  ;;  %v7581_v5 = vand.u32 4294901760, %v7562_v62  ;;  %v7590_v10 = vpack.c.bf16 %v1447_v54, %v1444_v53  ;;  %v7699_v54 = vld [vmem:[%s8217_s3 + $0x2] ss:$0 sm:$0xff] }
  0x11   :  { %7016 = vmatprep.subr.bf16.mxu1 %v8222_v3  ;;  %v1065_v7 = vsub.f32 %v7550_v57, %v1064_v63  ;;  %v1072_v8 = vsub.f32 %v7552_v58, %v1071_v0  ;;  %v7588_v9 = vand.u32 4294901760, %v7569_v1  ;;  %v7628_v32 = vpack.c.bf16 %v7552_v58, %v7550_v57 }
  0x12   :  { %8228 = vst [vmem:[#allocation8_spill] sm:$0xff] %v7581_v5  ;;  %v1524_v15 = vsub.f32 %v7556_v60, %v1523_v2  ;;  %v1531_v16 = vsub.f32 %v7558_v61, %v1530_v4  ;;  %v1054_v17 = vsub.f32 %v7562_v62, %v7581_v5  ;;  %v7632_v33 = vpack.c.bf16 %v7558_v61, %v7556_v60 }
  0x13   :  { %v1066_v21 = vand.u32 4294901760, %v1065_v7  ;;  %v1073_v22 = vand.u32 4294901760, %v1072_v8  ;;  %v1513_v23 = vsub.f32 %v7569_v1, %v7588_v9  ;;  %v7654_v34 = vpack.c.bf16 %v1071_v0, %v1064_v63  ;;  %v7719_v7 = vld [vmem:[%s8216_s2 + $0x1] ss:$0 sm:$0xff] }
  0x14   :  { %v1525_v24 = vand.u32 4294901760, %v1524_v15  ;;  %v1532_v27 = vand.u32 4294901760, %v1531_v16  ;;  %v7607_v28 = vand.u32 4294901760, %v1054_v17  ;;  %v7656_v35 = vpack.c.bf16 %v1530_v4, %v1523_v2 }
  0x15   :  { %6548 = vmatmul.mubr.f32.vlgmr.msra.gmra.mrb[0].mxu0 %v7446_v12  ;;  %v7610_v29 = vpack.c.bf16 %v1073_v22, %v1066_v21  ;;  %v7612_v30 = vand.u32 4294901760, %v1513_v23  ;;  %vm2171_vm2 = vcmask 64512  }
  0x16   :  { %6590 = vmatmul.mubr.f32.vlgmr.msra.gmra.mrb[0].mxu1 %v7448_v13  ;;  %7000 = vmatpush3.bf16.xpose.msra.mxu0 %v7492_v42  ;;  %v7614_v31 = vpack.c.bf16 %v1532_v27, %v1525_v24 }
  0x17   :  { %7018 = vmatpush3.bf16.xpose.msra.mxu1 %v7494_v43  ;;  %6554 = vmatprep.mubr.msk.f32.mxu0 %vm7375_vm0, %v8224_v11 }
  0x18   :  { %6596 = vmatprep.mubr.msk.f32.mxu1 %vm7375_vm0, %v8224_v11  ;;  %7001 = vmatprep.subr.bf16.mxu0 %v8222_v3 }
  0x19   :  { %7019 = vmatprep.subr.bf16.mxu1 %v8222_v3 }
  0x1d   :  { %6555 = vmatmul.mubr.f32.vlgmr.msra.gmra.mrb[0].mxu0 %v7455_v19 }
  0x1e   :  { %6597 = vmatmul.mubr.f32.vlgmr.msra.gmra.mrb[0].mxu1 %v7458_v20  ;;  %7003 = vmatpush3.bf16.xpose.msra.mxu0 %v7450_v14 }
  0x1f   :  { %7021 = vmatpush3.bf16.xpose.msra.mxu1 %v7452_v18  ;;  %6561 = vmatprep.mubr.msk.f32.mxu0 %vm7375_vm0, %v8224_v11 }
  0x20   :  { %6603 = vmatprep.mubr.msk.f32.mxu1 %vm7375_vm0, %v8224_v11  ;;  %7004 = vmatprep.subr.bf16.mxu0 %v8222_v3 }
  0x21   :  { %7022 = vmatprep.subr.bf16.mxu1 %v8222_v3 }
  0x25   :  { %6562 = vmatmul.mubr.f32.vlgmr.msra.gmra.mrb[0].mxu0 %v7463_v25 }
  0x26   :  { %6604 = vmatmul.mubr.f32.vlgmr.msra.gmra.mrb[0].mxu1 %v7467_v26  ;;  %7006 = vmatpush3.bf16.xpose.msra.mxu0 %v7516_v44 }
  0x27   :  { %7024 = vmatpush3.bf16.xpose.msra.mxu1 %v7518_v45  ;;  %6568 = vmatprep.mubr.msk.f32.mxu0 %vm7375_vm0, %v8224_v11 }
  0x28   :  { %6610 = vmatprep.mubr.msk.f32.mxu1 %vm7375_vm0, %v8224_v11  ;;  %7007 = vmatprep.subr.bf16.mxu0 %v8222_v3 }
  0x29   :  { %7025 = vmatprep.subr.bf16.mxu1 %v8222_v3 }
  0x2d   :  { %6569 = vmatmul.mubr.f32.vlgmr.msra.gmra.mrb[0].mxu0 %v7446_v12 }
  0x2e   :  { %6611 = vmatmul.mubr.f32.vlgmr.msra.gmra.mrb[0].mxu1 %v7448_v13  ;;  %7009 = vmatpush3.bf16.xpose.msra.mxu0 %v7450_v14 }
  0x2f   :  { %7027 = vmatpush3.bf16.xpose.msra.mxu1 %v7452_v18  ;;  %6575 = vmatprep.mubr.msk.f32.mxu0 %vm7375_vm0, %v8224_v11 }
  0x30   :  { %6617 = vmatprep.mubr.msk.f32.mxu1 %vm7375_vm0, %v8224_v11  ;;  %7028 = vmatprep.subr.bf16.mxu0 %v8222_v3 }
  0x31   :  { %7046 = vmatprep.subr.bf16.mxu1 %v8222_v3 }
  0x35   :  { %6576 = vmatmul.mubr.f32.vlgmr.msra.gmra.mrb[0].mxu0 %v7446_v12 }
  0x36   :  { %6618 = vmatmul.mubr.f32.vlgmr.msra.gmra.mrb[0].mxu1 %v7448_v13  ;;  %7030 = vmatpush3.bf16.xpose.msra.mxu0 %v7583_v6 }
  0x37   :  { %7048 = vmatpush3.bf16.xpose.msra.mxu1 %v7590_v10  ;;  %6624 = vmatprep.mubr.msk.f32.mxu0 %vm7375_vm0, %v8224_v11 }
  0x38   :  { %7031 = vmatprep.subr.bf16.mxu0 %v8222_v3  ;;  %6666 = vmatprep.mubr.msk.f32.mxu1 %vm7375_vm0, %v8224_v11 }
  0x39   :  { %7049 = vmatprep.subr.bf16.mxu1 %v8222_v3 }
  0x3d   :  { %6625 = vmatmul.mubr.f32.vlgmr.msra.gmra.mrb[2].mxu0 %v7607_v28 }
  0x3e   :  { %7033 = vmatpush3.bf16.xpose.msra.mxu0 %v7610_v29  ;;  %6667 = vmatmul.mubr.f32.vlgmr.msra.gmra.mrb[2].mxu1 %v7612_v30 }
  0x3f   :  { %7051 = vmatpush3.bf16.xpose.msra.mxu1 %v7614_v31  ;;  %6631 = vmatprep.mubr.msk.f32.mxu0 %vm7375_vm0, %v8224_v11 }
  0x40   :  { %7034 = vmatprep.subr.bf16.mxu0 %v8222_v3  ;;  %6673 = vmatprep.mubr.msk.f32.mxu1 %vm7375_vm0, %v8224_v11 }
  0x41   :  { %7052 = vmatprep.subr.bf16.mxu1 %v8222_v3 }
  0x45   :  { %6632 = vmatmul.mubr.f32.vlgmr.msra.gmra.mrb[2].mxu0 %v7548_v56 }
  0x46   :  { %7036 = vmatpush3.bf16.xpose.msra.mxu0 %v7628_v32  ;;  %6674 = vmatmul.mubr.f32.vlgmr.msra.gmra.mrb[2].mxu1 %v7554_v59 }
  0x47   :  { %7054 = vmatpush3.bf16.xpose.msra.mxu1 %v7632_v33  ;;  %6638 = vmatprep.mubr.msk.f32.mxu0 %vm7375_vm0, %v8224_v11 }
  0x48   :  { %7037 = vmatprep.subr.bf16.mxu0 %v8222_v3  ;;  %6680 = vmatprep.mubr.msk.f32.mxu1 %vm7375_vm0, %v8224_v11 }
  0x49   :  { %7055 = vmatprep.subr.bf16.mxu1 %v8222_v3 }
  0x4d   :  { %6639 = vmatmul.mubr.f32.vlgmr.msra.gmra.mrb[2].mxu0 %v7562_v62 }
  0x4e   :  { %7039 = vmatpush3.bf16.xpose.msra.mxu0 %v7583_v6  ;;  %6681 = vmatmul.mubr.f32.vlgmr.msra.gmra.mrb[2].mxu1 %v7569_v1 }
  0x4f   :  { %7057 = vmatpush3.bf16.xpose.msra.mxu1 %v7590_v10  ;;  %6645 = vmatprep.mubr.msk.f32.mxu0 %vm7375_vm0, %v8224_v11 }
  0x50   :  { %7040 = vmatprep.subr.bf16.mxu0 %v8222_v3  ;;  %6687 = vmatprep.mubr.msk.f32.mxu1 %vm7375_vm0, %v8224_v11 }
  0x51   :  { %7058 = vmatprep.subr.bf16.mxu1 %v8222_v3 }
  0x55   :  { %6646 = vmatmul.mubr.f32.vlgmr.msra.gmra.mrb[2].mxu0 %v7581_v5 }
  0x56   :  { %7042 = vmatpush3.bf16.xpose.msra.mxu0 %v7654_v34  ;;  %6688 = vmatmul.mubr.f32.vlgmr.msra.gmra.mrb[2].mxu1 %v7588_v9 }
  0x57   :  { %7060 = vmatpush3.bf16.xpose.msra.mxu1 %v7656_v35  ;;  %6652 = vmatprep.mubr.msk.f32.mxu0 %vm7375_vm0, %v8224_v11 }
  0x58   :  { %7043 = vmatprep.subr.bf16.mxu0 %v8222_v3  ;;  %6694 = vmatprep.mubr.msk.f32.mxu1 %vm7375_vm0, %v8224_v11 }
  0x59   :  { %7061 = vmatprep.subr.bf16.mxu1 %v8222_v3 }
  0x5d   :  { %6653 = vmatmul.mubr.f32.vlgmr.msra.gmra.mrb[2].mxu0 %v7548_v56 }
  0x5e   :  { %7045 = vmatpush3.bf16.xpose.msra.mxu0 %v7583_v6  ;;  %6695 = vmatmul.mubr.f32.vlgmr.msra.gmra.mrb[2].mxu1 %v7554_v59 }
  0x5f   :  { %7063 = vmatpush3.bf16.xpose.msra.mxu1 %v7590_v10  ;;  %6659 = vmatprep.mubr.msk.f32.mxu0 %vm7375_vm0, %v8224_v11 }
  0x60   :  { %6701 = vmatprep.mubr.msk.f32.mxu1 %vm7375_vm0, %v8224_v11  ;;  %7082 = vmatprep.subr.bf16.mxu1 %v8222_v3 }
  0x61   :  { %7064 = vmatprep.subr.bf16.mxu0 %v8222_v3 }
  0x65   :  { %6660 = vmatmul.mubr.f32.vlgmr.msra.gmra.mrb[2].mxu0 %v7548_v56 }
  0x66   :  { %6702 = vmatmul.mubr.f32.vlgmr.msra.gmra.mrb[2].mxu1 %v7554_v59  ;;  %7066 = vmatpush3.bf16.msra.mxu0 %v7450_v14 }
  0x67   :  { %7084 = vmatpush3.bf16.msra.mxu1 %v7452_v18  ;;  %6750 = vmatprep.mubr.msk.f32.mxu1 %vm7375_vm0, %v8224_v11 }
  0x68   :  { %7085 = vmatprep.subr.bf16.mxu1 %v8222_v3  ;;  %6708 = vmatprep.mubr.msk.f32.mxu0 %vm7375_vm0, %v8224_v11 }
  0x69   :  { %7067 = vmatprep.subr.bf16.mxu0 %v8222_v3 }
 0x108   :  { %v521_v39 = vpop.f32.mrb[0].mxu0 }
 0x109   :  { %v980_v47 = vpop.f32.mrb[0].mxu1  ;;  %v6577_v48 = vpop.f32.mrb[1].mxu0  ;;  %v2054_v49 = vmul.f32 %v6312_v36, %v521_v39 }
 0x10a   :  { %1934 = vxpose.xlu1.b32.start.end [1/1] (short) (narrow) %v980_v47, 16  ;;  %v6619_v50 = vpop.f32.mrb[1].mxu1  ;;  %v2055_v51 = vmul.f32 %v6313_v46, %v980_v47 }
 0x10b   :  { %v2059_v52 = vsel %vm2058_vm1, %v2054_v49, -inf }
 0x10c   :  { %2060 = vmax.xlane.f32.xlu0 %v2059_v52  ;;  %v2062_v53 = vsel %vm2058_vm1, %v2055_v51, -inf }
 0x110   :  { %2063 = vmax.xlane.f32.xlu0 %v2062_v53 }
 0x138   :  { %v1439_v57 = vpop.f32.mrb[2].mxu0 }
 0x139   :  { %v7707_v58 = vmul.f32 %v7699_v54, %v1439_v57  ;;  %v1898_v60 = vpop.f32.mrb[2].mxu1  ;;  %v6661_v61 = vpop.f32.mrb[3].mxu0 }
 0x13a   :  { %v7710_v63 = vmul.f32 %v7704_v55, %v1898_v60  ;;  %v6703_v0 = vpop.f32.mrb[3].mxu1 }
 0x13b   :  { %v2065_v2 = vsel %vm2058_vm1, %v7707_v58, -inf  ;;  %v7736_v0 = vld [vmem:[%s8216_s2] ss:$0 sm:$0xff] }
 0x13c   :  { %2066 = vmax.xlane.f32.xlu1 %v2065_v2  ;;  %v2068_v4 = vsel %vm2058_vm1, %v7710_v63, -inf }
 0x13d   :  { %1902 = vxpose.xlu0.b32.start.end [1/1] (short) (narrow) %v521_v39, 16 }
 0x140   :  { %2069 = vmax.xlane.f32.xlu1 %v2068_v4 }
 0x18a   :  { %v1950_v8 = vpop.trf.xlu1 }
 0x18b   :  { %v7722_v15 = vmul.f32 %v7719_v7, %v1950_v8 }
 0x18d   :  { %v2178_v16 = vsel %vm2171_vm2, %v7722_v15, -inf }
 0x18e   :  { %v1951_v17 = vpop.trf.xlu1  ;;  %2179 = vmax.xlane.f32.xlu1 %v2178_v16 }
 0x18f   :  { %v7727_v21 = vmul.f32 %v7719_v7, %v1951_v17 }
 0x191   :  { %v2181_v22 = vsel %vm2171_vm2, %v7727_v21, -inf }
 0x192   :  { %2182 = vmax.xlane.f32.xlu1 %v2181_v22 }
 0x199   :  { %v2061_v23 = vpop.xlane.xlu0 %2060 }
 0x19a   :  { %v2071_v53 = vsub.f32 %v2054_v49, %v2061_v23 }
 0x19c   :  { %v2075_v61 = vmul.f32 1.442695, %v2071_v53 }
 0x19d   :  { %v2064_v24 = vpop.xlane.xlu0 %2063 }
 0x19e   :  { %v2072_v27 = vsub.f32 %v2055_v51, %v2064_v24 }
 0x1a0   :  { %v2077_v39 = vmul.f32 1.442695, %v2072_v27 }
 0x1a2   :  { %7266 = vpow2.f32 %v2077_v39 }
 0x1a3   :  { %7268 = vpow2.f32 %v2075_v61 }
 0x1ac   :  { %v7267_v47 = vpop.eup %7266 }
 0x1ad   :  { %v2090_v48 = vsel %vm2058_vm1, %v7267_v47, 0.0  ;;  %v2084_v50 = vmul.f32 %v7267_v47, %v6313_v46  ;;  %v7269_v16 = vpop.eup %7268 }
 0x1ae   :  { %2091 = vadd.xlane.f32.xlu1 %v2090_v48  ;;  %v2087_v17 = vsel %vm2058_vm1, %v7269_v16, 0.0  ;;  %v2083_v22 = vmul.f32 %v7269_v16, %v6312_v36 }
 0x1af   :  { %v2102_v52 = vsel %vm2058_vm1, %v2084_v50, 0.0 }
 0x1b0   :  { %v2099_v23 = vsel %vm2058_vm1, %v2083_v22, 0.0 }
 0x1b2   :  { %2103 = vadd.xlane.f32.xlu1 %v2102_v52 }
 0x1bd   :  { %v1918_v2 = vpop.trf.xlu0 }
 0x1be   :  { %v7739_v51 = vmul.f32 %v7736_v0, %v1918_v2 }
 0x1c0   :  { %v2172_v4 = vsel %vm2171_vm2, %v7739_v51, -inf }
 0x1c1   :  { %2173 = vmax.xlane.f32.xlu0 %v2172_v4  ;;  %v1919_v46 = vpop.trf.xlu0 }
 0x1c2   :  { %v7744_v8 = vmul.f32 %v7736_v0, %v1919_v46 }
 0x1c4   :  { %v2175_v49 = vsel %vm2171_vm2, %v7744_v8, -inf }
 0x1c5   :  { %2176 = vmax.xlane.f32.xlu0 %v2175_v49 }
 0x1c9   :  { %2088 = vadd.xlane.f32.xlu0 %v2087_v17  ;;  %v7750_v24 = vpop.xlane.xlu1 %2066 }
 0x1cd   :  { %2100 = vadd.xlane.f32.xlu0 %v2099_v23  ;;  %v2070_v27 = vpop.xlane.xlu1 %2069 }
 0x1e5   :  { %1998 = vxpose.xlu1.b32.start.end [1/1] (short) (narrow) %v1898_v60, 16 }
 0x1fa   :  { %1966 = vxpose.xlu0.b32.start.end [1/1] (short) (narrow) %v1439_v57, 16 }
 0x21b   :  { %v2180_v39 = vpop.xlane.xlu1 %2179 }
 0x21f   :  { %v2183_v47 = vpop.xlane.xlu1 %2182 }
 0x23b   :  { %v2092_v48 = vpop.xlane.xlu1 %2091 }
 0x23c   :  { %v2112_v52 = vmul.f32 1e-13, %v2092_v48 }
 0x23f   :  { %v2104_v53 = vpop.xlane.xlu1 %2103 }
 0x240   :  { %v2116_v61 = vadd.f32 %v2112_v52, %v2104_v53  ;;  %v2074_v53 = vsub.f32 %v7710_v63, %v2070_v27  ;;  %v7769_v63 = vld [vmem:[%s8216_s2 + $0x3] ss:$0 sm:$0xff] }
 0x242   :  { %7270 = vrcp.f32 %v2116_v61 }
 0x24c   :  { %v7271_v2 = vpop.eup %7270 }
 0x24d   :  { %v2124_v4 = vmul.f32 %v7271_v2, %v2116_v61 }
 0x24e   :  { %v7752_v46 = vpop.xlane.xlu0 %2173 }
 0x24f   :  { %v2128_v36 = vsub.f32 2.0, %v2124_v4 }
 0x251   :  { %v2132_v49 = vmul.f32 %v7271_v2, %v2128_v36  ;;  %v2081_v2 = vmul.f32 1.442695, %v2074_v53  ;;  %v8230_v36 = vmov 0.0|0.0  }
 0x252   :  { %v7754_v16 = vpop.xlane.xlu0 %2176 }
 0x253   :  { %v2136_v60 = vmul.f32 %v2132_v49, %v2084_v50  ;;  %v8229_v50 = vmov 0.0   ;;  %v2198_v49 = vsub.f32 %v7722_v15, %v2180_v39 }
 0x255   :  { %v2795_v57 = vsel %vm2058_vm1, %v2136_v60, 0  ;;  %v2208_v60 = vmul.f32 1.442695, %v2198_v49  ;;  %v2073_v49 = vsub.f32 %v7707_v58, %v7750_v24 }
 0x256   :  { %v7757_v17 = vand.u32 4294901760, %v2795_v57  ;;  %v2089_v23 = vpop.xlane.xlu0 %2088 }
 0x257   :  { %v2111_v48 = vmul.f32 1e-13, %v2089_v23 }
 0x258   :  { %v2865_v3 = vsub.f32 %v2795_v57, %v7757_v17 }
 0x25a   :  { %v2101_v11 = vpop.xlane.xlu0 %2100  ;;  %v2866_v52 = vand.u32 4294901760, %v2865_v3 }
 0x25b   :  { %v2115_v61 = vadd.f32 %v2111_v48, %v2101_v11  ;;  %v2199_v48 = vsub.f32 %v7727_v21, %v2183_v47 }
 0x25c   :  { %v2867_v5 = vsub.f32 %v2865_v3, %v2866_v52 }
 0x25d   :  { %7272 = vrcp.f32 %v2115_v61 }
 0x25e   :  { %v2868_v4 = vand.u32 4294901760, %v2867_v5  ;;  %7274 = vpow2.f32 %v2081_v2 }
 0x25f   :  { %7276 = vpow2.f32 %v2208_v60 }
 0x260   :  { %6751 = vmatmul.mubr.f32.vlgmr.msra.gmra.mrb[4].mxu1 %v2868_v4 }
 0x261   :  { %7087 = vmatpush3.bf16.msra.mxu1 %v7481_v41  ;;  %6757 = vmatprep.mubr.msk.f32.mxu1 %vm7375_vm0, %v8229_v50 }
 0x262   :  { %7088 = vmatprep.subr.bf16.mxu1 %v8230_v36 }
 0x265   :  { %v2014_v11 = vpop.trf.xlu1 }
 0x266   :  { %v7772_v5 = vmul.f32 %v7769_v63, %v2014_v11 }
 0x267   :  { %v7273_v27 = vpop.eup %7272 }
 0x268   :  { %v2123_v41 = vmul.f32 %v7273_v27, %v2115_v61  ;;  %6758 = vmatmul.mubr.f32.vlgmr.msra.gmra.mrb[4].mxu1 %v7757_v17  ;;  %v2190_v57 = vsel %vm2171_vm2, %v7772_v5, -inf  ;;  %v7275_v4 = vpop.eup %7274 }
 0x269   :  { %2191 = vmax.xlane.f32.xlu1 %v2190_v57  ;;  %v2015_v23 = vpop.trf.xlu1  ;;  %7090 = vmatpush3.bf16.msra.mxu1 %v7494_v43  ;;  %v2210_v43 = vmul.f32 1.442695, %v2199_v48  ;;  %v7792_v60 = vmul.f32 %v7275_v4, %v7704_v55  ;;  %v7277_v55 = vpop.eup %7276 }
 0x26a   :  { %v2127_v15 = vsub.f32 2.0, %v2123_v41  ;;  %v7779_v39 = vmul.f32 %v7769_v63, %v2015_v23  ;;  %6764 = vmatprep.mubr.msk.f32.mxu1 %vm7375_vm0, %v8229_v50  ;;  %7091 = vmatprep.subr.bf16.mxu1 %v8230_v36  ;;  %v2096_v41 = vsel %vm2058_vm1, %v7275_v4, 0.0  ;;  %v2234_v57 = vsel %vm2171_vm2, %v7277_v55, 0.0  ;;  %v7815_v23 = vld [vmem:[%s8216_s2 + $0x2] ss:$0 sm:$0xff] }
 0x26b   :  { %7278 = vpow2.f32 %v2210_v43  ;;  %v2197_v43 = vsub.f32 %v7744_v8, %v7754_v16 }
 0x26c   :  { %v2131_v53 = vmul.f32 %v7273_v27, %v2127_v15  ;;  %v2193_v61 = vsel %vm2171_vm2, %v7779_v39, -inf  ;;  %v2196_v27 = vsub.f32 %v7739_v51, %v7752_v46  ;;  %v7818_v15 = vmul.f32 %v7277_v55, %v7719_v7 }
 0x26d   :  { %2194 = vmax.xlane.f32.xlu1 %v2193_v61  ;;  %v2206_v8 = vmul.f32 1.442695, %v2197_v43 }
 0x26e   :  { %v2135_v2 = vmul.f32 %v2131_v53, %v2083_v22  ;;  %v2108_v22 = vsel %vm2058_vm1, %v7792_v60, 0.0  ;;  %v2204_v46 = vmul.f32 1.442695, %v2196_v27 }
 0x270   :  { %v2333_v11 = vsel %vm2058_vm1, %v2135_v2, 0  ;;  %6765 = vmatmul.mubr.f32.vlgmr.msra.gmra.mrb[4].mxu1 %v2865_v3  ;;  %v2079_v3 = vmul.f32 1.442695, %v2073_v49 }
 0x271   :  { %v7794_v21 = vand.u32 4294901760, %v2333_v11  ;;  %2097 = vadd.xlane.f32.xlu1 %v2096_v41  ;;  %7093 = vmatpush3.bf16.msra.mxu1 %v7452_v18 }
 0x272   :  { %6771 = vmatprep.mubr.msk.f32.mxu1 %vm7375_vm0, %v8229_v50  ;;  %7094 = vmatprep.subr.bf16.mxu1 %v8230_v36  ;;  %7280 = vpow2.f32 %v2079_v3 }
 0x273   :  { %v7801_v58 = vsub.f32 %v2333_v11, %v7794_v21  ;;  %7282 = vpow2.f32 %v2204_v46 }
 0x274   :  { %7284 = vpow2.f32 %v2206_v8 }
 0x275   :  { %2109 = vadd.xlane.f32.xlu1 %v2108_v22  ;;  %v2404_v24 = vand.u32 4294901760, %v7801_v58 }
 0x277   :  { %v2405_v47 = vsub.f32 %v7801_v58, %v2404_v24 }
 0x278   :  { %6772 = vmatmul.mubr.f32.vlgmr.msra.gmra.mrb[4].mxu1 %v2866_v52  ;;  %v2258_v52 = vsel %vm2171_vm2, %v7818_v15, 0.0 }
 0x279   :  { %2235 = vadd.xlane.f32.xlu1 %v2234_v57  ;;  %v2406_v48 = vand.u32 4294901760, %v2405_v47  ;;  %7096 = vmatpush3.bf16.msra.mxu1 %v7518_v45  ;;  %v7279_v45 = vpop.eup %7278 }
 0x27a   :  { %v1982_v53 = vpop.trf.xlu0  ;;  %6778 = vmatprep.mubr.msk.f32.mxu1 %vm7375_vm0, %v8229_v50  ;;  %7097 = vmatprep.subr.bf16.mxu1 %v8230_v36  ;;  %v7843_v49 = vmul.f32 %v7279_v45, %v7719_v7 }
 0x27b   :  { %v7825_v51 = vmul.f32 %v7815_v23, %v1982_v53  ;;  %6709 = vmatmul.mubr.f32.vlgmr.msra.gmra.mrb[4].mxu0 %v2406_v48 }
 0x27c   :  { %7069 = vmatpush3.bf16.msra.mxu0 %v7478_v40  ;;  %6715 = vmatprep.mubr.msk.f32.mxu0 %vm7375_vm0, %v8229_v50  ;;  %v2237_v40 = vsel %vm2171_vm2, %v7279_v45, 0.0  ;;  %v7281_v41 = vpop.eup %7280  ;;  %v2261_v7 = vsel %vm2171_vm2, %v7843_v49, 0.0 }
 0x27d   :  { %2259 = vadd.xlane.f32.xlu1 %v2258_v52  ;;  %v2184_v61 = vsel %vm2171_vm2, %v7825_v51, -inf  ;;  %7070 = vmatprep.subr.bf16.mxu0 %v8230_v36  ;;  %v7859_v16 = vmul.f32 %v7281_v41, %v7699_v54 }
 0x27e   :  { %2185 = vmax.xlane.f32.xlu0 %v2184_v61  ;;  %v1983_v4 = vpop.trf.xlu0 }
 0x27f   :  { %v7836_v2 = vmul.f32 %v7815_v23, %v1983_v4  ;;  %v2105_v3 = vsel %vm2058_vm1, %v7859_v16, 0.0 }
 0x280   :  { %6779 = vmatmul.mubr.f32.vlgmr.msra.gmra.mrb[4].mxu1 %v7757_v17 }
 0x281   :  { %2238 = vadd.xlane.f32.xlu1 %v2237_v40  ;;  %v2187_v11 = vsel %vm2171_vm2, %v7836_v2, -inf  ;;  %7099 = vmatpush3.bf16.msra.mxu1 %v7452_v18  ;;  %v2093_v18 = vsel %vm2058_vm1, %v7281_v41, 0.0 }
 0x282   :  { %2188 = vmax.xlane.f32.xlu0 %v2187_v11  ;;  %6785 = vmatprep.mubr.msk.f32.mxu1 %vm7375_vm0, %v8229_v50 }
 0x283   :  { %6716 = vmatmul.mubr.f32.vlgmr.msra.gmra.mrb[4].mxu0 %v7794_v21  ;;  %7118 = vmatprep.subr.bf16.mxu1 %v8230_v36 }
 0x284   :  { %7072 = vmatpush3.bf16.msra.mxu0 %v7492_v42  ;;  %6722 = vmatprep.mubr.msk.f32.mxu0 %vm7375_vm0, %v8229_v50  ;;  %v7283_v42 = vpop.eup %7282 }
 0x285   :  { %2262 = vadd.xlane.f32.xlu1 %v2261_v7  ;;  %7073 = vmatprep.subr.bf16.mxu0 %v8230_v36  ;;  %v2228_v54 = vsel %vm2171_vm2, %v7283_v42, 0.0  ;;  %v7285_v55 = vpop.eup %7284 }
 0x286   :  { %2094 = vadd.xlane.f32.xlu0 %v2093_v18  ;;  %v2231_v47 = vsel %vm2171_vm2, %v7285_v55, 0.0  ;;  %v7887_v27 = vmul.f32 %v7285_v55, %v7736_v0 }
 0x288   :  { %6786 = vmatmul.mubr.f32.vlgmr.msra.gmra.mrb[4].mxu1 %v7757_v17  ;;  %v7875_v17 = vmul.f32 %v7283_v42, %v7736_v0  ;;  %v2255_v57 = vsel %vm2171_vm2, %v7887_v27, 0.0 }
 0x289   :  { %7120 = vmatpush3.bf16.msra.mxu1 %v7590_v10  ;;  %6834 = vmatprep.mubr.msk.f32.mxu1 %vm7375_vm0, %v8229_v50 }
 0x28a   :  { %2106 = vadd.xlane.f32.xlu0 %v2105_v3  ;;  %7121 = vmatprep.subr.bf16.mxu1 %v8230_v36  ;;  %v2252_v22 = vsel %vm2171_vm2, %v7875_v17, 0.0 }
 0x28b   :  { %6723 = vmatmul.mubr.f32.vlgmr.msra.gmra.mrb[4].mxu0 %v7801_v58 }
 0x28c   :  { %7075 = vmatpush3.bf16.msra.mxu0 %v7450_v14  ;;  %6729 = vmatprep.mubr.msk.f32.mxu0 %vm7375_vm0, %v8229_v50 }
 0x28d   :  { %7076 = vmatprep.subr.bf16.mxu0 %v8230_v36 }
 0x28e   :  { %2229 = vadd.xlane.f32.xlu0 %v2228_v54 }
 0x292   :  { %2253 = vadd.xlane.f32.xlu0 %v2252_v22 }
 0x293   :  { %6730 = vmatmul.mubr.f32.vlgmr.msra.gmra.mrb[4].mxu0 %v2404_v24 }
 0x294   :  { %7078 = vmatpush3.bf16.msra.mxu0 %v7516_v44  ;;  %6736 = vmatprep.mubr.msk.f32.mxu0 %vm7375_vm0, %v8229_v50  ;;  %v7377_v44 = vmov 0  }
 0x295   :  { %7079 = vmatprep.subr.bf16.mxu0 %v8230_v36  ;;  %7265 = vset.pattern.permute.xlu1 %v7377_v44 }
 0x296   :  { %2232 = vadd.xlane.f32.xlu0 %v2231_v47 }
 0x297   :  { %7264 = vset.pattern.permute.xlu0 %v7377_v44 }
 0x29a   :  { %2256 = vadd.xlane.f32.xlu0 %v2255_v57 }
 0x29b   :  { %6737 = vmatmul.mubr.f32.vlgmr.msra.gmra.mrb[4].mxu0 %v7794_v21 }
 0x29c   :  { %7081 = vmatpush3.bf16.msra.mxu0 %v7450_v14  ;;  %6743 = vmatprep.mubr.msk.f32.mxu0 %vm7375_vm0, %v8229_v50 }
 0x29d   :  { %7100 = vmatprep.subr.bf16.mxu0 %v8230_v36 }
 0x2a3   :  { %6744 = vmatmul.mubr.f32.vlgmr.msra.gmra.mrb[4].mxu0 %v7794_v21 }
 0x2a4   :  { %7102 = vmatpush3.bf16.msra.mxu0 %v7583_v6  ;;  %6792 = vmatprep.mubr.msk.f32.mxu0 %vm7375_vm0, %v8229_v50 }
 0x2a5   :  { %7103 = vmatprep.subr.bf16.mxu0 %v8230_v36 }
 0x2f6   :  { %v2192_v0 = vpop.xlane.xlu1 %2191 }
 0x2f7   :  { %v2202_v14 = vsub.f32 %v7772_v5, %v2192_v0 }
 0x2f9   :  { %v2216_v58 = vmul.f32 1.442695, %v2202_v14 }
 0x2fa   :  { %v2195_v24 = vpop.xlane.xlu1 %2194 }
 0x2fb   :  { %7286 = vpow2.f32 %v2216_v58  ;;  %v2203_v48 = vsub.f32 %v7779_v39, %v2195_v24 }
 0x2fd   :  { %v2218_v53 = vmul.f32 1.442695, %v2203_v48 }
 0x2fe   :  { %v2098_v21 = vpop.xlane.xlu1 %2097 }
 0x2ff   :  { %7288 = vpow2.f32 %v2218_v53  ;;  %v2114_v46 = vmul.f32 1e-13, %v2098_v21 }
 0x302   :  { %v2110_v52 = vpop.xlane.xlu1 %2109 }
 0x303   :  { %v2118_v45 = vadd.f32 %v2114_v46, %v2110_v52 }
 0x305   :  { %v7287_v61 = vpop.eup %7286  ;;  %7290 = vrcp.f32 %v2118_v45 }
 0x306   :  { %v2236_v4 = vpop.xlane.xlu1 %2235  ;;  %v2246_v43 = vsel %vm2171_vm2, %v7287_v61, 0.0  ;;  %v7906_v40 = vmul.f32 %v7287_v61, %v7769_v63 }
 0x307   :  { %2247 = vadd.xlane.f32.xlu1 %v2246_v43 }
 0x308   :  { %v2270_v11 = vsel %vm2171_vm2, %v7906_v40, 0.0 }
 0x309   :  { %v7289_v39 = vpop.eup %7288 }
 0x30a   :  { %v2260_v5 = vpop.xlane.xlu1 %2259  ;;  %v2249_v18 = vsel %vm2171_vm2, %v7289_v39, 0.0  ;;  %v7913_v3 = vmul.f32 %v7289_v39, %v7769_v63 }
 0x30b   :  { %v2186_v41 = vpop.xlane.xlu0 %2185  ;;  %2271 = vadd.xlane.f32.xlu1 %v2270_v11 }
 0x30c   :  { %v2200_v8 = vsub.f32 %v7825_v51, %v2186_v41  ;;  %v2273_v0 = vsel %vm2171_vm2, %v7913_v3, 0.0  ;;  %v2278_v51 = vmul.f32 1e-13, %v2236_v4 }
 0x30e   :  { %v2212_v7 = vmul.f32 1.442695, %v2200_v8  ;;  %v2239_v55 = vpop.xlane.xlu1 %2238  ;;  %v2286_v24 = vadd.f32 %v2278_v51, %v2260_v5  ;;  %v54_v51 = vld [vmem:[%s8218_s4 + $0x10] sm:$0xff] }
 0x30f   :  { %v7291_v42 = vpop.eup %7290  ;;  %v2189_v54 = vpop.xlane.xlu0 %2188  ;;  %2250 = vadd.xlane.f32.xlu1 %v2249_v18  ;;  %v2279_v21 = vmul.f32 1e-13, %v2239_v55 }
 0x310   :  { %v2126_v22 = vmul.f32 %v7291_v42, %v2118_v45  ;;  %7292 = vpow2.f32 %v2212_v7  ;;  %v2201_v47 = vsub.f32 %v7836_v2, %v2189_v54  ;;  %v53_v54 = vld [vmem:[%s8218_s4 + $0x8] sm:$0xff] }
 0x312   :  { %v2130_v57 = vsub.f32 2.0, %v2126_v22  ;;  %v2214_v44 = vmul.f32 1.442695, %v2201_v47  ;;  %v2263_v48 = vpop.xlane.xlu1 %2262 }
 0x313   :  { %v2095_v14 = vpop.xlane.xlu0 %2094  ;;  %2274 = vadd.xlane.f32.xlu1 %v2273_v0  ;;  %v2287_v61 = vadd.f32 %v2279_v21, %v2263_v48  ;;  %v55_v21 = vld [vmem:[%s8218_s4 + $0x18] sm:$0xff] }
 0x314   :  { %v2134_v58 = vmul.f32 %v7291_v42, %v2130_v57  ;;  %7294 = vpow2.f32 %v2214_v44  ;;  %v2113_v53 = vmul.f32 1e-13, %v2095_v14 }
 0x315   :  { %7296 = vrcp.f32 %v2286_v24 }
 0x316   :  { %v2138_v63 = vmul.f32 %v2134_v58, %v7792_v60 }
 0x317   :  { %v2107_v46 = vpop.xlane.xlu0 %2106 }
 0x318   :  { %v3719_v52 = vsel %vm2058_vm1, %v2138_v63, 0  ;;  %v2117_v2 = vadd.f32 %v2113_v53, %v2107_v46 }
 0x319   :  { %v7920_v45 = vand.u32 4294901760, %v3719_v52 }
 0x31a   :  { %v7293_v43 = vpop.eup %7292  ;;  %7298 = vrcp.f32 %v2117_v2 }
 0x31b   :  { %v7923_v4 = vsub.f32 %v3719_v52, %v7920_v45  ;;  %v2230_v5 = vpop.xlane.xlu0 %2229  ;;  %v2240_v60 = vsel %vm2171_vm2, %v7293_v43, 0.0  ;;  %v7927_v11 = vmul.f32 %v7293_v43, %v7815_v23  ;;  %7300 = vrcp.f32 %v2287_v61 }
 0x31c   :  { %2241 = vadd.xlane.f32.xlu0 %v2240_v60  ;;  %v2276_v53 = vmul.f32 1e-13, %v2230_v5 }
 0x31d   :  { %v3790_v39 = vand.u32 4294901760, %v7923_v4  ;;  %v2264_v8 = vsel %vm2171_vm2, %v7927_v11, 0.0 }
 0x31e   :  { %v7295_v18 = vpop.eup %7294 }
 0x31f   :  { %v2254_v41 = vpop.xlane.xlu0 %2253  ;;  %v3791_v7 = vsub.f32 %v7923_v4, %v3790_v39  ;;  %v7297_v22 = vpop.eup %7296  ;;  %v2243_v55 = vsel %vm2171_vm2, %v7295_v18, 0.0  ;;  %v7940_v47 = vmul.f32 %v7295_v18, %v7815_v23 }
 0x320   :  { %2265 = vadd.xlane.f32.xlu0 %v2264_v8  ;;  %v2302_v58 = vmul.f32 %v7297_v22, %v2286_v24 }
 0x321   :  { %v3792_v42 = vand.u32 4294901760, %v3791_v7  ;;  %v2267_v63 = vsel %vm2171_vm2, %v7940_v47, 0.0 }
 0x322   :  { %v2310_v46 = vsub.f32 2.0, %v2302_v58 }
 0x323   :  { %6835 = vmatmul.mubr.f32.vlgmr.msra.gmra.mrb[6].mxu1 %v3792_v42  ;;  %v2233_v0 = vpop.xlane.xlu0 %2232 }
 0x324   :  { %v7299_v57 = vpop.eup %7298  ;;  %2244 = vadd.xlane.f32.xlu0 %v2243_v55  ;;  %4187 = vperm.xlu1 %7265, %v53_v54   ;;  %v2277_v24 = vmul.f32 1e-13, %v2233_v0 }
 0x325   :  { %v2125_v44 = vmul.f32 %v7299_v57, %v2117_v2  ;;  %7123 = vmatpush3.bf16.msra.mxu1 %v7614_v31  ;;  %6841 = vmatprep.mubr.msk.f32.mxu1 %vm7375_vm0, %v8229_v50  ;;  %v7301_v14 = vpop.eup %7300  ;;  %v2284_v2 = vadd.f32 %v2276_v53, %v2254_v41 }
 0x326   :  { %7124 = vmatprep.subr.bf16.mxu1 %v8230_v36  ;;  %v2303_v31 = vmul.f32 %v7301_v14, %v2287_v61 }
 0x327   :  { %v2129_v23 = vsub.f32 2.0, %v2125_v44  ;;  %v2257_v43 = vpop.xlane.xlu0 %2256  ;;  %7302 = vrcp.f32 %v2284_v2 }
 0x328   :  { %2268 = vadd.xlane.f32.xlu0 %v2267_v63  ;;  %4192 = vperm.xlu1 %7265, %v54_v51   ;;  %v2311_v61 = vsub.f32 2.0, %v2303_v31  ;;  %v2285_v8 = vadd.f32 %v2277_v24, %v2257_v43 }
 0x329   :  { %v2133_v48 = vmul.f32 %v7299_v57, %v2129_v23 }
 0x32a   :  { %v2319_v7 = vmul.f32 %v7301_v14, %v2311_v61  ;;  %7304 = vrcp.f32 %v2285_v8 }
 0x32b   :  { %v2137_v52 = vmul.f32 %v2133_v48, %v7859_v16  ;;  %6842 = vmatmul.mubr.f32.vlgmr.msra.gmra.mrb[6].mxu1 %v7920_v45  ;;  %v2318_v16 = vmul.f32 %v7297_v22, %v2310_v46  ;;  %v59_v48 = vld [vmem:[%s8219_s5 + $0x8] sm:$0xff]  ;;  %v60_v46 = vld [vmem:[%s8219_s5 + $0x10] sm:$0xff] }
 0x32c   :  { %7126 = vmatpush3.bf16.msra.mxu1 %v7632_v33  ;;  %6848 = vmatprep.mubr.msk.f32.mxu1 %vm7375_vm0, %v8229_v50  ;;  %v2327_v54 = vmul.f32 %v2319_v7, %v7843_v49  ;;  %v52_v49 = vld [vmem:[%s8218_s4] sm:$0xff]  ;;  %s7326_s4 = scalar_lea.vmem %s6286_s25, 1024 }
 0x32d   :  { %v3257_v5 = vsel %vm2058_vm1, %v2137_v52, 0  ;;  %7127 = vmatprep.subr.bf16.mxu1 %v8230_v36  ;;  %4197 = vperm.xlu1 %7265, %v55_v21   ;;  %v2326_v18 = vmul.f32 %v2318_v16, %v7818_v15  ;;  %p7327_p0 = scmp.ne.s32.totalorder %s6286_s25, %s7326_s4  ;;  %p7332_p2 = scmp.lt.s32.totalorder %s7326_s4, %s7326_s4 }
 0x32e   :  { %v7961_v60 = vand.u32 4294901760, %v3257_v5  ;;  %v4703_v44 = vsel %vm2171_vm2, %v2327_v54, 0 }
 0x32f   :  { %v4700_v55 = vsel %vm2171_vm2, %v2326_v18, 0  ;;  %p7333_p3 = por %p7332_p2, %p7331_p1 }
 0x330   :  { %v7964_v41 = vsub.f32 %v3257_v5, %v7961_v60  ;;  %v7981_v57 = vand.u32 4294901760, %v4700_v55 }
 0x331   :  { %v7303_v15 = vpop.eup %7302  ;;  %p7334_p4 = pnand %p7333_p3, %p7327_p0 }
 0x332   :  { %v3328_v33 = vand.u32 4294901760, %v7964_v41  ;;  %v2300_v51 = vmul.f32 %v7303_v15, %v2284_v2  ;;  %v7997_v14 = vsub.f32 %v4700_v55, %v7981_v57 }
 0x333   :  { %6849 = vmatmul.mubr.f32.vlgmr.msra.gmra.mrb[6].mxu1 %v7923_v4 }
 0x334   :  { %v3329_v42 = vsub.f32 %v7964_v41, %v3328_v33  ;;  %7129 = vmatpush3.bf16.msra.mxu1 %v7590_v10  ;;  %6855 = vmatprep.mubr.msk.f32.mxu1 %vm7375_vm0, %v8229_v50  ;;  %v7305_v0 = vpop.eup %7304  ;;  %v2308_v58 = vsub.f32 2.0, %v2300_v51  ;;  %v4773_v23 = vand.u32 4294901760, %v7997_v14 }
 0x335   :  { %7130 = vmatprep.subr.bf16.mxu1 %v8230_v36  ;;  %v2301_v4 = vmul.f32 %v7305_v0, %v2285_v8 }
 0x336   :  { %v3330_v22 = vand.u32 4294901760, %v3329_v42  ;;  %v2316_v53 = vmul.f32 %v7303_v15, %v2308_v58  ;;  %v4774_v31 = vsub.f32 %v7997_v14, %v4773_v23 }
 0x337   :  { %v2309_v63 = vsub.f32 2.0, %v2301_v4 }
 0x338   :  { %6793 = vmatmul.mubr.f32.vlgmr.msra.gmra.mrb[6].mxu0 %v3330_v22  ;;  %v2324_v52 = vmul.f32 %v2316_v53, %v7875_v17  ;;  %v4775_v2 = vand.u32 4294901760, %v4774_v31  ;;  %v61_v17 = vld [vmem:[%s8219_s5 + $0x18] sm:$0xff] }
 0x339   :  { %7105 = vmatpush3.bf16.msra.mxu0 %v7610_v29  ;;  %6799 = vmatprep.mubr.msk.f32.mxu0 %vm7375_vm0, %v8229_v50  ;;  %v7993_v29 = vand.u32 4294901760, %v4703_v44  ;;  %v2317_v21 = vmul.f32 %v7305_v0, %v2309_v63 }
 0x33a   :  { %7106 = vmatprep.subr.bf16.mxu0 %v8230_v36  ;;  %v4205_v24 = vsel %vm2171_vm2, %v2324_v52, 0 }
 0x33b   :  { %6856 = vmatmul.mubr.f32.vlgmr.msra.gmra.mrb[6].mxu1 %v3790_v39  ;;  %v58_v39 = vld [vmem:[%s8219_s5] sm:$0xff]  ;;  %v2325_v43 = vmul.f32 %v2317_v21, %v7887_v27  ;;  %v8039_v61 = vand.u32 4294901760, %v4205_v24 }
 0x33c   :  { %7132 = vmatpush3.bf16.msra.mxu1 %v7656_v35  ;;  %6862 = vmatprep.mubr.msk.f32.mxu1 %vm7375_vm0, %v8229_v50  ;;  %v8004_v35 = vsub.f32 %v4703_v44, %v7993_v29  ;;  %v7314_v44 = vld [vmem:[%s8214_s0 + $0x8] sm:$0xff] }
 0x33d   :  { %7133 = vmatprep.subr.bf16.mxu1 %v8230_v36  ;;  %6186 = vperm.xlu1 %7265, %v58_v39   ;;  %v4208_v8 = vsel %vm2171_vm2, %v2325_v43, 0 }
 0x33e   :  { %4182 = vperm.xlu0 %7264, %v52_v49   ;;  %v4286_v27 = vand.u32 4294901760, %v4208_v8 }
 0x340   :  { %6800 = vmatmul.mubr.f32.vlgmr.msra.gmra.mrb[6].mxu0 %v7961_v60  ;;  %v4287_v16 = vsub.f32 %v4208_v8, %v4286_v27 }
 0x341   :  { %7108 = vmatpush3.bf16.msra.mxu0 %v7628_v32  ;;  %6806 = vmatprep.mubr.msk.f32.mxu0 %vm7375_vm0, %v8229_v50  ;;  %v4783_v32 = vand.u32 4294901760, %v8004_v35 }
 0x342   :  { %7109 = vmatprep.subr.bf16.mxu0 %v8230_v36  ;;  %6191 = vperm.xlu1 %7265, %v59_v48  }
 0x343   :  { %6863 = vmatmul.mubr.f32.vlgmr.msra.gmra.mrb[6].mxu1 %v7920_v45 }
 0x344   :  { %7135 = vmatpush3.bf16.msra.mxu1 %v7590_v10  ;;  %6869 = vmatprep.mubr.msk.f32.mxu1 %vm7375_vm0, %v8229_v50  ;;  %v4784_v10 = vsub.f32 %v8004_v35, %v4783_v32 }
 0x345   :  { %6902 = vmatprep.subr.mxu1 %v7448_v13 }
 0x346   :  { %6196 = vperm.xlu1 %7265, %v60_v46   ;;  %v4785_v5 = vand.u32 4294901760, %v4784_v10 }
 0x348   :  { %6807 = vmatmul.mubr.f32.vlgmr.msra.gmra.mrb[6].mxu0 %v7964_v41 }
 0x349   :  { %7111 = vmatpush3.bf16.msra.mxu0 %v7583_v6  ;;  %6813 = vmatprep.mubr.msk.f32.mxu0 %vm7375_vm0, %v8229_v50 }
 0x34a   :  { %7112 = vmatprep.subr.bf16.mxu0 %v8230_v36  ;;  %6201 = vperm.xlu1 %7265, %v61_v17  }
 0x34b   :  { %6870 = vmatmul.mubr.f32.vlgmr.msra.gmra.mrb[6].mxu1 %v7920_v45  ;;  %v4277_v45 = vsub.f32 %v4205_v24, %v8039_v61 }
 0x34c   :  { %6904 = vmatprep.mubr.f32.mxu1 %v4775_v2  ;;  %6903 = vmatpush3.msra.mxu1 %v7448_v13 }
 0x34d   :  { %6907 = vmatprep.subr.mxu1 %v7476_v38  ;;  %v4278_v41 = vand.u32 4294901760, %v4277_v45 }
 0x34f   :  { %6905 = vmatmul.mubr.f32.vlgmr.msra.gmra.mrb[8].mxu1 %v4785_v5 }
 0x350   :  { %6814 = vmatmul.mubr.f32.vlgmr.msra.gmra.mrb[6].mxu0 %v3328_v33  ;;  %6909 = vmatprep.mubr.f32.mxu1 %v7981_v57 }
 0x351   :  { %7114 = vmatpush3.bf16.msra.mxu0 %v7654_v34  ;;  %6908 = vmatpush3.msra.mxu1 %v7476_v38  ;;  %v4288_v38 = vand.u32 4294901760, %v4287_v16 }
 0x352   :  { %6820 = vmatprep.mubr.msk.f32.mxu0 %vm7375_vm0, %v8229_v50  ;;  %7115 = vmatprep.subr.bf16.mxu0 %v8230_v36  ;;  %v4279_v36 = vsub.f32 %v4277_v45, %v4278_v41 }
 0x353   :  { %6912 = vmatprep.subr.mxu1 %v7458_v20  ;;  %v4289_v33 = vsub.f32 %v4287_v16, %v4288_v38 }
 0x354   :  { %v4280_v18 = vand.u32 4294901760, %v4279_v36 }
 0x357   :  { %6910 = vmatmul.mubr.f32.vlgmr.msra.gmra.mrb[8].mxu1 %v7993_v29 }
 0x358   :  { %6821 = vmatmul.mubr.f32.vlgmr.msra.gmra.mrb[6].mxu0 %v7961_v60  ;;  %6914 = vmatprep.mubr.f32.mxu1 %v7997_v14 }
 0x359   :  { %7117 = vmatpush3.bf16.msra.mxu0 %v7583_v6  ;;  %6913 = vmatpush3.msra.mxu1 %v7458_v20  ;;  %v4290_v20 = vand.u32 4294901760, %v4289_v33 }
 0x35a   :  { %6827 = vmatprep.mubr.msk.f32.mxu0 %vm7375_vm0, %v8229_v50  ;;  %6872 = vmatprep.subr.mxu0 %v7446_v12 }
 0x35b   :  { %v8060_v34 = vpop.f32.mrb[4].mxu1  ;;  %6917 = vmatprep.subr.mxu1 %v7448_v13 }
 0x35c   :  { %v6787_v7 = vpop.f32.mrb[5].mxu1 }
 0x35f   :  { %6915 = vmatmul.mubr.f32.vlgmr.msra.gmra.mrb[8].mxu1 %v8004_v35 }
 0x360   :  { %6828 = vmatmul.mubr.f32.vlgmr.msra.gmra.mrb[6].mxu0 %v7961_v60  ;;  %6919 = vmatprep.mubr.f32.mxu1 %v4773_v23 }
 0x361   :  { %6874 = vmatprep.mubr.f32.mxu0 %v4280_v18  ;;  %6873 = vmatpush3.msra.mxu0 %v7446_v12 }
 0x362   :  { %6918 = vmatpush3.msra.mxu1 %v7448_v13  ;;  %6877 = vmatprep.subr.mxu0 %v7474_v37 }
 0x363   :  { %6922 = vmatprep.subr.mxu1 %v7467_v26 }
 0x364   :  { %6875 = vmatmul.mubr.f32.vlgmr.msra.gmra.mrb[8].mxu0 %v4290_v20 }
 0x365   :  { %6879 = vmatprep.mubr.f32.mxu0 %v8039_v61  ;;  %6878 = vmatpush3.msra.mxu0 %v7474_v37 }
 0x366   :  { %6882 = vmatprep.subr.mxu0 %v7455_v19 }
 0x367   :  { %6920 = vmatmul.mubr.f32.vlgmr.msra.gmra.mrb[8].mxu1 %v4783_v32 }
 0x368   :  { %6924 = vmatprep.mubr.f32.mxu1 %v7981_v57  ;;  %6923 = vmatpush3.msra.mxu1 %v7467_v26 }
 0x369   :  { %6927 = vmatprep.subr.mxu1 %v7448_v13 }
 0x36c   :  { %6880 = vmatmul.mubr.f32.vlgmr.msra.gmra.mrb[8].mxu0 %v4286_v27 }
 0x36d   :  { %6884 = vmatprep.mubr.f32.mxu0 %v4277_v45  ;;  %6883 = vmatpush3.msra.mxu0 %v7455_v19 }
 0x36e   :  { %6887 = vmatprep.subr.mxu0 %v7446_v12 }
 0x36f   :  { %6925 = vmatmul.mubr.f32.vlgmr.msra.gmra.mrb[8].mxu1 %v7993_v29 }
 0x370   :  { %6929 = vmatprep.mubr.f32.mxu1 %v7981_v57  ;;  %6928 = vmatpush3.msra.mxu1 %v7448_v13 }
 0x371   :  { %6962 = vmatprep.subr.mxu1 %v7554_v59 }
 0x374   :  { %6885 = vmatmul.mubr.f32.vlgmr.msra.gmra.mrb[8].mxu0 %v4287_v16  ;;  %v65_v16 = vld [vmem:[%s8219_s5 + $0x38] sm:$0xff] }
 0x375   :  { %6889 = vmatprep.mubr.f32.mxu0 %v4278_v41  ;;  %6888 = vmatpush3.msra.mxu0 %v7446_v12 }
 0x376   :  { %v8082_v26 = vpop.f32.mrb[4].mxu0  ;;  %6892 = vmatprep.subr.mxu0 %v7463_v25 }
 0x377   :  { %v6745_v37 = vpop.f32.mrb[5].mxu0  ;;  %6930 = vmatmul.mubr.f32.vlgmr.msra.gmra.mrb[8].mxu1 %v7993_v29 }
 0x378   :  { %6963 = vmatpush3.msra.mxu1 %v7554_v59  ;;  %v7315_v37 = vld [vmem:[%s8214_s0] sm:$0xff] }
 0x379   :  { %6967 = vmatprep.subr.mxu1 %v7612_v30 }
 0x37c   :  { %6890 = vmatmul.mubr.f32.vlgmr.msra.gmra.mrb[8].mxu0 %v4288_v38 }
 0x37d   :  { %6894 = vmatprep.mubr.f32.mxu0 %v8039_v61  ;;  %6893 = vmatpush3.msra.mxu0 %v7463_v25 }
 0x37e   :  { %6897 = vmatprep.subr.mxu0 %v7446_v12 }
 0x384   :  { %6895 = vmatmul.mubr.f32.vlgmr.msra.gmra.mrb[8].mxu0 %v4286_v27 }
 0x385   :  { %6899 = vmatprep.mubr.f32.mxu0 %v8039_v61  ;;  %6898 = vmatpush3.msra.mxu0 %v7446_v12  ;;  %v62_v12 = vld [vmem:[%s8219_s5 + $0x20] sm:$0xff] }
 0x386   :  { %6932 = vmatprep.subr.mxu0 %v7548_v56  ;;  %6206 = vperm.xlu1 %7265, %v62_v12  }
 0x38c   :  { %6900 = vmatmul.mubr.f32.vlgmr.msra.gmra.mrb[8].mxu0 %v4286_v27  ;;  %v63_v27 = vld [vmem:[%s8219_s5 + $0x28] sm:$0xff] }
 0x38d   :  { %6933 = vmatpush3.msra.mxu0 %v7548_v56  ;;  %6211 = vperm.xlu0 %7264, %v63_v27  }
 0x38e   :  { %6937 = vmatprep.subr.mxu0 %v7607_v28 }
 0x391   :  { %6221 = vperm.xlu0 %7264, %v65_v16  }
 0x394   :  { %v2248_v13 = vpop.xlane.xlu1 %2247 }
 0x395   :  { %v2282_v19 = vmul.f32 1e-13, %v2248_v13 }
 0x398   :  { %v2272_v6 = vpop.xlane.xlu1 %2271 }
 0x399   :  { %v2290_v50 = vadd.f32 %v2282_v19, %v2272_v6 }
 0x39b   :  { %7306 = vrcp.f32 %v2290_v50 }
 0x39c   :  { %v2251_v25 = vpop.xlane.xlu1 %2250 }
 0x39d   :  { %v2283_v60 = vmul.f32 1e-13, %v2251_v25 }
 0x3a0   :  { %v2275_v42 = vpop.xlane.xlu1 %2274 }
 0x3a1   :  { %v2291_v54 = vadd.f32 %v2283_v60, %v2275_v42 }
 0x3a3   :  { %7308 = vrcp.f32 %v2291_v54 }
 0x3a4   :  { %v4188_v22 = vpop.permute.xlu1 %4187 }
 0x3a5   :  { %v7307_v55 = vpop.eup %7306  ;;  %v4201_v15 = vmul.f32 %v4188_v22, %v8060_v34 }
 0x3a6   :  { %v2306_v57 = vmul.f32 %v7307_v55, %v2290_v50 }
 0x3a7   :  { %v6233_v49 = vsub.f32 %v7314_v44, %v4201_v15  ;;  %v6241_v0 = vmul.f32 %v7314_v44, %v4201_v15 }
 0x3a8   :  { %v2314_v51 = vsub.f32 2.0, %v2306_v57 }
 0x3a9   :  { %6237 = vst [vmem:[#allocation2 + $0x10] sm:$0xff] %v6233_v49  ;;  %6245 = vst [vmem:[#allocation2 + $0x18] sm:$0xff] %v6241_v0  ;;  %v2242_v29 = vpop.xlane.xlu0 %2241 }
 0x3aa   :  { %v2322_v14 = vmul.f32 %v7307_v55, %v2314_v51  ;;  %v2280_v39 = vmul.f32 1e-13, %v2242_v29  ;;  %v7316_v29 = vld [vmem:[%s8214_s0 + $0x18] sm:$0xff] }
 0x3ac   :  { %v2330_v4 = vmul.f32 %v2322_v14, %v7906_v40  ;;  %v64_v40 = vld [vmem:[%s8219_s5 + $0x30] sm:$0xff] }
 0x3ad   :  { %v7309_v58 = vpop.eup %7308  ;;  %v2266_v35 = vpop.xlane.xlu0 %2265  ;;  %6216 = vperm.xlu1 %7265, %v64_v40  }
 0x3ae   :  { %v5690_v23 = vsel %vm2171_vm2, %v2330_v4, 0  ;;  %v2307_v63 = vmul.f32 %v7309_v58, %v2291_v54  ;;  %v2288_v48 = vadd.f32 %v2280_v39, %v2266_v35 }
 0x3af   :  { %v8105_v53 = vand.u32 4294901760, %v5690_v23 }
 0x3b0   :  { %v2315_v32 = vsub.f32 2.0, %v2307_v63  ;;  %7310 = vrcp.f32 %v2288_v48 }
 0x3b1   :  { %v2245_v31 = vpop.xlane.xlu0 %2244  ;;  %v5762_v21 = vsub.f32 %v5690_v23, %v8105_v53 }
 0x3b2   :  { %v2323_v46 = vmul.f32 %v7309_v58, %v2315_v32  ;;  %v2281_v2 = vmul.f32 1e-13, %v2245_v31 }
 0x3b3   :  { %v5763_v52 = vand.u32 4294901760, %v5762_v21 }
 0x3b4   :  { %v2331_v10 = vmul.f32 %v2323_v46, %v7913_v3 }
 0x3b5   :  { %v2269_v43 = vpop.xlane.xlu0 %2268  ;;  %v5764_v17 = vsub.f32 %v5762_v21, %v5763_v52 }
 0x3b6   :  { %v5693_v24 = vsel %vm2171_vm2, %v2331_v10, 0  ;;  %v2289_v5 = vadd.f32 %v2281_v2, %v2269_v43  ;;  %v7318_v10 = vld [vmem:[%s8215_s1 + $0x18] sm:$0xff] }
 0x3b7   :  { %v8113_v61 = vand.u32 4294901760, %v5693_v24  ;;  %v5765_v8 = vand.u32 4294901760, %v5764_v17  ;;  %v7319_v17 = vld [vmem:[%s8215_s1 + $0x10] sm:$0xff] }
 0x3b8   :  { %7312 = vrcp.f32 %v2289_v5 }
 0x3b9   :  { %v5772_v45 = vsub.f32 %v5693_v24, %v8113_v61  ;;  %6964 = vmatprep.mubr.f32.mxu1 %v5765_v8 }
 0x3ba   :  { %v7311_v3 = vpop.eup %7310 }
 0x3bb   :  { %v2304_v41 = vmul.f32 %v7311_v3, %v2288_v48  ;;  %v5773_v38 = vand.u32 4294901760, %v5772_v45 }
 0x3bd   :  { %v2312_v34 = vsub.f32 2.0, %v2304_v41  ;;  %v4183_v36 = vpop.permute.xlu0 %4182  ;;  %v5774_v7 = vsub.f32 %v5772_v45, %v5773_v38 }
 0x3be   :  { %v4200_v33 = vmul.f32 %v4183_v36, %v8082_v26 }
 0x3bf   :  { %v2320_v18 = vmul.f32 %v7311_v3, %v2312_v34  ;;  %v5775_v20 = vand.u32 4294901760, %v5774_v7 }
 0x3c0   :  { %v6232_v13 = vsub.f32 %v7315_v37, %v4200_v33  ;;  %v6240_v19 = vmul.f32 %v7315_v37, %v4200_v33 }
 0x3c1   :  { %v2328_v6 = vmul.f32 %v2320_v18, %v7927_v11  ;;  %6965 = vmatmul.mubr.f32.vlgmr.msra.gmra.mrb[10].mxu1 %v5775_v20 }
 0x3c2   :  { %v7313_v50 = vpop.eup %7312  ;;  %6236 = vst [vmem:[#allocation2] sm:$0xff] %v6232_v13  ;;  %6244 = vst [vmem:[#allocation2 + $0x8] sm:$0xff] %v6240_v19  ;;  %6969 = vmatprep.mubr.f32.mxu1 %v8105_v53  ;;  %6968 = vmatpush3.msra.mxu1 %v7612_v30 }
 0x3c3   :  { %v5195_v26 = vsel %vm2171_vm2, %v2328_v6, 0  ;;  %v2305_v25 = vmul.f32 %v7313_v50, %v2289_v5  ;;  %6972 = vmatprep.subr.mxu1 %v7569_v1 }
 0x3c4   :  { %v5266_v60 = vand.u32 4294901760, %v5195_v26 }
 0x3c5   :  { %v2313_v42 = vsub.f32 2.0, %v2305_v25 }
 0x3c6   :  { %v5267_v54 = vsub.f32 %v5195_v26, %v5266_v60 }
 0x3c7   :  { %v2321_v12 = vmul.f32 %v7313_v50, %v2313_v42 }
 0x3c8   :  { %v5268_v22 = vand.u32 4294901760, %v5267_v54 }
 0x3c9   :  { %v2329_v11 = vmul.f32 %v2321_v12, %v7940_v47  ;;  %6970 = vmatmul.mubr.f32.vlgmr.msra.gmra.mrb[10].mxu1 %v8113_v61 }
 0x3ca   :  { %6974 = vmatprep.mubr.f32.mxu1 %v5762_v21  ;;  %v5269_v55 = vsub.f32 %v5267_v54, %v5268_v22  ;;  %6973 = vmatpush3.msra.mxu1 %v7569_v1  ;;  %v8231_v1 = vld [vmem:[#allocation8_spill] sm:$0xff] }
 0x3cb   :  { %v5198_v30 = vsel %vm2171_vm2, %v2329_v11, 0  ;;  %6977 = vmatprep.subr.mxu1 %v7554_v59 }
 0x3cc   :  { %v5276_v15 = vand.u32 4294901760, %v5198_v30  ;;  %v5270_v57 = vand.u32 4294901760, %v5269_v55 }
 0x3ce   :  { %v5277_v44 = vsub.f32 %v5198_v30, %v5276_v15  ;;  %6934 = vmatprep.mubr.f32.mxu0 %v5270_v57 }
 0x3d0   :  { %v5278_v49 = vand.u32 4294901760, %v5277_v44 }
 0x3d1   :  { %6975 = vmatmul.mubr.f32.vlgmr.msra.gmra.mrb[10].mxu1 %v5772_v45 }
 0x3d2   :  { %6979 = vmatprep.mubr.f32.mxu1 %v5763_v52  ;;  %v5279_v0 = vsub.f32 %v5277_v44, %v5278_v49  ;;  %6978 = vmatpush3.msra.mxu1 %v7554_v59 }
 0x3d3   :  { %6982 = vmatprep.subr.mxu1 %v7588_v9 }
 0x3d4   :  { %v5280_v47 = vand.u32 4294901760, %v5279_v0 }
 0x3d6   :  { %6935 = vmatmul.mubr.f32.vlgmr.msra.gmra.mrb[10].mxu0 %v5280_v47 }
 0x3d7   :  { %6938 = vmatpush3.msra.mxu0 %v7607_v28  ;;  %6939 = vmatprep.mubr.f32.mxu0 %v5266_v60 }
 0x3d8   :  { %6942 = vmatprep.subr.mxu0 %v7562_v62 }
 0x3d9   :  { %6980 = vmatmul.mubr.f32.vlgmr.msra.gmra.mrb[10].mxu1 %v5773_v38 }
 0x3da   :  { %6984 = vmatprep.mubr.f32.mxu1 %v8105_v53  ;;  %6983 = vmatpush3.msra.mxu1 %v7588_v9 }
 0x3db   :  { %6987 = vmatprep.subr.mxu1 %v7554_v59 }
 0x3de   :  { %6940 = vmatmul.mubr.f32.vlgmr.msra.gmra.mrb[10].mxu0 %v5276_v15 }
 0x3df   :  { %6943 = vmatpush3.msra.mxu0 %v7562_v62  ;;  %6944 = vmatprep.mubr.f32.mxu0 %v5267_v54 }
 0x3e0   :  { %6947 = vmatprep.subr.mxu0 %v7548_v56 }
 0x3e1   :  { %6985 = vmatmul.mubr.f32.vlgmr.msra.gmra.mrb[10].mxu1 %v8113_v61 }
 0x3e2   :  { %6989 = vmatprep.mubr.f32.mxu1 %v8105_v53  ;;  %6988 = vmatpush3.msra.mxu1 %v7554_v59  ;;  %v4193_v59 = vpop.permute.xlu1 %4192 }
 0x3e6   :  { %6945 = vmatmul.mubr.f32.vlgmr.msra.gmra.mrb[10].mxu0 %v5277_v44  ;;  %v4198_v62 = vpop.permute.xlu1 %4197 }
 0x3e7   :  { %6948 = vmatpush3.msra.mxu0 %v7548_v56  ;;  %6949 = vmatprep.mubr.f32.mxu0 %v5268_v22 }
 0x3e8   :  { %6952 = vmatprep.subr.mxu0 %v8231_v1 }
 0x3e9   :  { %6990 = vmatmul.mubr.f32.vlgmr.msra.gmra.mrb[10].mxu1 %v8113_v61 }
 0x3ea   :  { %v6187_v48 = vpop.permute.xlu1 %6186 }
 0x3ee   :  { %6950 = vmatmul.mubr.f32.vlgmr.msra.gmra.mrb[10].mxu0 %v5278_v49  ;;  %v6192_v53 = vpop.permute.xlu1 %6191 }
 0x3ef   :  { %6953 = vmatpush3.msra.mxu0 %v8231_v1  ;;  %6954 = vmatprep.mubr.f32.mxu0 %v5266_v60 }
 0x3f0   :  { %6957 = vmatprep.subr.mxu0 %v7548_v56 }
 0x3f2   :  { %v6197_v32 = vpop.permute.xlu1 %6196 }
 0x3f6   :  { %6955 = vmatmul.mubr.f32.vlgmr.msra.gmra.mrb[10].mxu0 %v5276_v15  ;;  %v6202_v31 = vpop.permute.xlu1 %6201 }
 0x3f7   :  { %6958 = vmatpush3.msra.mxu0 %v7548_v56  ;;  %6959 = vmatprep.mubr.f32.mxu0 %v5266_v60  ;;  %v7317_v56 = vld [vmem:[%s8214_s0 + $0x10] sm:$0xff] }
 0x3fe   :  { %6960 = vmatmul.mubr.f32.vlgmr.msra.gmra.mrb[10].mxu0 %v5276_v15 }
 0x41e   :  { %v4176_v9 = vpop.f32.mrb[6].mxu1 }
 0x41f   :  { %v4203_v28 = vmul.f32 %v4198_v62, %v4176_v9  ;;  %v6871_v51 = vpop.f32.mrb[7].mxu1 }
 0x421   :  { %v6235_v14 = vsub.f32 %v7316_v29, %v4203_v28  ;;  %v6243_v4 = vmul.f32 %v7316_v29, %v4203_v28 }
 0x423   :  { %6239 = vst [vmem:[#allocation2 + $0x30] sm:$0xff] %v6235_v14  ;;  %6247 = vst [vmem:[#allocation2 + $0x38] sm:$0xff] %v6243_v4 }
 0x433   :  { %v3714_v39 = vpop.f32.mrb[6].mxu0 }
 0x434   :  { %v4202_v58 = vmul.f32 %v4193_v59, %v3714_v39  ;;  %v6829_v35 = vpop.f32.mrb[7].mxu0 }
 0x436   :  { %v6234_v23 = vsub.f32 %v7317_v56, %v4202_v58  ;;  %v6242_v63 = vmul.f32 %v7317_v56, %v4202_v58 }
 0x438   :  { %6238 = vst [vmem:[#allocation2 + $0x20] sm:$0xff] %v6234_v23  ;;  %6246 = vst [vmem:[#allocation2 + $0x28] sm:$0xff] %v6242_v63 }
 0x44a   :  { %v6931_v21 = vpop.f32.mrb[8].mxu1 }
 0x44b   :  { %v6227_v46 = vmul.f32 %v6931_v21, %v6202_v31  ;;  %v5184_v52 = vpop.f32.mrb[9].mxu1 }
 0x44c   :  { %v6226_v40 = vmul.f32 %v6197_v32, %v5184_v52 }
 0x44d   :  { %v6251_v2 = vsub.f32 %v7318_v10, %v6227_v46  ;;  %v6267_v43 = vmul.f32 %v7318_v10, %v6227_v46 }
 0x44e   :  { %v6250_v24 = vsub.f32 %v7319_v17, %v6226_v40  ;;  %v6266_v5 = vmul.f32 %v7319_v17, %v6226_v40 }
 0x44f   :  { %6259 = vst [vmem:[#allocation4 + $0x30] sm:$0xff] %v6251_v2  ;;  %6275 = vst [vmem:[#allocation4 + $0x38] sm:$0xff] %v6267_v43 }
 0x450   :  { %6258 = vst [vmem:[#allocation4 + $0x20] sm:$0xff] %v6250_v24  ;;  %6274 = vst [vmem:[#allocation4 + $0x28] sm:$0xff] %v6266_v5 }
 0x451   :  { %7337 = shalt.err (!%p7334_p4)
}
 0x452   :  { %s7338_s28 = scalar_lea.hbm %s8220_s6, 1024 }
 0x453   :  { %p7339_p5 = scmp.ne.s32.totalorder %s8220_s6, %s7338_s28  ;;  %p7342_p6 = scmp.lt.u32.totalorder %s7338_s28, %s8220_s6 }
 0x455   :  { %p7344_p7 = pnand %p7342_p6, %p7339_p5 }
 0x457   :  { %7347 = shalt.err (!%p7344_p7)
}
 0x458   :  { %s7379_s3 = smov 256   ;;  %s7380_s10 = smov 16   ;;  %v7320_v3 = vld [vmem:[%s8215_s1 + $0x8] sm:$0xff]  ;;  %v7321_v38 = vld [vmem:[%s8215_s1] sm:$0xff]  ;;  %v6212_v7 = vpop.permute.xlu0 %6211  ;;  %v6207_v33 = vpop.permute.xlu1 %6206  ;;  %v7322_v50 = vld [vmem:[%s8215_s1 + $0x38] sm:$0xff] }
 0x459   :  { %6291 = dma.vmem_to_hbm [thread:$0]  %s6286_s25, 1024, %s8220_s6, [#allocation3], %s7379_s3, %s7379_s3, %s7380_s10  }
 0x45a   :  { %v7323_v60 = vld [vmem:[%s8215_s1 + $0x30] sm:$0xff]  ;;  %s7381_s18 = smov [#allocation4]   ;;  %v7324_v30 = vld [vmem:[%s8215_s1 + $0x28] sm:$0xff]  ;;  %v7325_v44 = vld [vmem:[%s8215_s1 + $0x20] sm:$0xff] }
 0x45b   :  { %s6297_s19 = sshll.u32 %s7381_s18, 4  ;;  %s6298_s19 = int_to_ptr.vmem [resolvable:$true] %s6297_s19 }
 0x45c   :  { %v6222_v18 = vpop.permute.xlu0 %6221  ;;  %v6217_v37 = vpop.permute.xlu1 %6216  ;;  %s7348_s0 = scalar_lea.vmem %s6298_s19, 2048  ;;  %p7353_p9 = scmp.lt.s32.totalorder %s6298_s19, %s6298_s19 }
 0x45d   :  { %p7349_p8 = scmp.ne.s32.totalorder %s6298_s19, %s7348_s0  ;;  %p7354_p10 = scmp.lt.s32.totalorder %s7348_s0, %s7348_s0 }
 0x45f   :  { %v6901_v61 = vpop.f32.mrb[8].mxu0  ;;  %p7355_p11 = por %p7354_p10, %p7353_p9 }
 0x460   :  { %v6225_v8 = vmul.f32 %v6901_v61, %v6192_v53  ;;  %v4689_v27 = vpop.f32.mrb[9].mxu0 }
 0x461   :  { %v6224_v45 = vmul.f32 %v6187_v48, %v4689_v27  ;;  %p7356_p12 = pnand %p7355_p11, %p7349_p8 }
 0x462   :  { %v6249_v16 = vsub.f32 %v7320_v3, %v6225_v8  ;;  %v6265_v41 = vmul.f32 %v7320_v3, %v6225_v8 }
 0x463   :  { %v6248_v34 = vsub.f32 %v7321_v38, %v6224_v45  ;;  %v6264_v36 = vmul.f32 %v7321_v38, %v6224_v45 }
 0x464   :  { %6257 = vst [vmem:[#allocation4 + $0x10] sm:$0xff] %v6249_v16  ;;  %6273 = vst [vmem:[#allocation4 + $0x18] sm:$0xff] %v6265_v41 }
 0x465   :  { %6256 = vst [vmem:[#allocation4] sm:$0xff] %v6248_v34  ;;  %6272 = vst [vmem:[#allocation4 + $0x8] sm:$0xff] %v6264_v36 }
 0x4bc   :  { %v6991_v20 = vpop.f32.mrb[10].mxu1 }
 0x4bd   :  { %v6231_v13 = vmul.f32 %v6991_v20, %v6222_v18  ;;  %v6174_v19 = vpop.f32.mrb[11].mxu1 }
 0x4be   :  { %v6230_v6 = vmul.f32 %v6217_v37, %v6174_v19 }
 0x4bf   :  { %v6255_v26 = vsub.f32 %v7322_v50, %v6231_v13  ;;  %v6271_v25 = vmul.f32 %v7322_v50, %v6231_v13 }
 0x4c0   :  { %v6254_v42 = vsub.f32 %v7323_v60, %v6230_v6  ;;  %v6270_v54 = vmul.f32 %v7323_v60, %v6230_v6 }
 0x4c1   :  { %6263 = vst [vmem:[#allocation4 + $0x70] sm:$0xff] %v6255_v26  ;;  %6279 = vst [vmem:[#allocation4 + $0x78] sm:$0xff] %v6271_v25 }
 0x4c2   :  { %6262 = vst [vmem:[#allocation4 + $0x60] sm:$0xff] %v6254_v42  ;;  %6278 = vst [vmem:[#allocation4 + $0x68] sm:$0xff] %v6270_v54 }
 0x4d1   :  { %v6961_v12 = vpop.f32.mrb[10].mxu0 }
 0x4d2   :  { %v6229_v22 = vmul.f32 %v6961_v12, %v6212_v7  ;;  %v5679_v11 = vpop.f32.mrb[11].mxu0 }
 0x4d3   :  { %v6228_v55 = vmul.f32 %v6207_v33, %v5679_v11 }
 0x4d4   :  { %v6253_v15 = vsub.f32 %v7324_v30, %v6229_v22  ;;  %v6269_v57 = vmul.f32 %v7324_v30, %v6229_v22 }
 0x4d5   :  { %v6252_v49 = vsub.f32 %v7325_v44, %v6228_v55  ;;  %v6268_v0 = vmul.f32 %v7325_v44, %v6228_v55 }
 0x4d6   :  { %6261 = vst [vmem:[#allocation4 + $0x50] sm:$0xff] %v6253_v15  ;;  %6277 = vst [vmem:[#allocation4 + $0x58] sm:$0xff] %v6269_v57 }
 0x4d7   :  { %6260 = vst [vmem:[#allocation4 + $0x40] sm:$0xff] %v6252_v49  ;;  %6276 = vst [vmem:[#allocation4 + $0x48] sm:$0xff] %v6268_v0 }
 0x4d8   :  { %7359 = shalt.err (!%p7356_p12)
}
 0x4d9   :  { %s7360_s4 = scalar_lea.hbm %s8221_s7, 2048 }
 0x4da   :  { %p7361_p13 = scmp.ne.s32.totalorder %s8221_s7, %s7360_s4  ;;  %p7364_p0 = scmp.lt.u32.totalorder %s7360_s4, %s8221_s7 }
 0x4dc   :  { %p7366_p1 = pnand %p7364_p0, %p7361_p13 }
 0x4de   :  { %7369 = shalt.err (!%p7366_p1)
}
 0x4df   :  { %6303 = dma.vmem_to_hbm [thread:$0]  %s6298_s19, 2048, %s8221_s7, [#allocation5], %s7379_s3, %s7379_s3, %s7380_s10  }
 0x4e0   :  { %7370 = dma.done.wait [#allocation3], 1024  }
 0x4e1   :  { %7371 = vsyncadd [#allocation3], 4294966272 }
 0x4e2   :  { %7372 = dma.done.wait [#allocation5], 2048  }
 0x4e3   :  { %7373 = vsyncadd [#allocation5], 4294965248 }
 0x4e4   :  { %6310 = vsyncpa [#allocation3], 1 }
 0x4e5   :  { %6311 = vsyncpa [#allocation5], 1 }

</bundles_post_ra>
